<compile_context>
chip_gen: v6e
topology: v6e:2x2x1
jax: 0.10.0
libtpu: 0.0.40
codegen_flags: <defaults>
</compile_context>

<pallas_src>
import functools

import jax
import jax.numpy as jnp
from jax import lax
from jax.experimental import pallas as pl
from jax.experimental.pallas import tpu as pltpu


# ---------------------------------------------------------------------------
# Single fused kernel
# ---------------------------------------------------------------------------
def fused_kernel(x_ref, w1_ref, gamma_ref, beta_ref, w2s_ref, mask_ref,
                 o_ref, pp_ref, *, W, eps):
    """Channel-major fused ReLU->1x1conv->BN->ReLU->3x3conv.

    x_ref:     [Cin,  M]      M = N*H*W (batch+spatial flattened on lanes)
    w1_ref:    [Cmid, Cin]
    gamma/beta:[Cmid, 1]
    w2s_ref:   [9*Cout, Cmid] tap-stacked 3x3 weights, tap k = dy*3 + dx
    mask_ref:  [9, 1, Mp]     per-tap validity mask (handles zero padding)
    o_ref:     [Cout, M]      channel-major output (already NCHW-flat)
    pp_ref:    [9*Cout, Mp]   VMEM scratch, Mp = M rounded up to 128 lanes
    """
    Cmid = w1_ref.shape[0]
    M = x_ref.shape[1]
    rows, Mp = pp_ref.shape
    Cout = o_ref.shape[0]

    # ---- ReLU + 1x1 conv as a single channel-major matmul (MXU) ----
    xr = jnp.maximum(x_ref[...], 0.0)                                  # [Cin, M]
    y = jnp.dot(w1_ref[...], xr, preferred_element_type=jnp.float32)   # [Cmid, M]

    # ---- training-mode BatchNorm statistics (biased variance) ----
    mean = jnp.mean(y, axis=1, keepdims=True)                          # [Cmid, 1]
    var = jnp.mean((y - mean) ** 2, axis=1, keepdims=True)             # [Cmid, 1]
    scale = gamma_ref[...] * lax.rsqrt(var + eps)
    shift = beta_ref[...] - mean * scale

    # ---- BN fold + ReLU ----
    z = jnp.maximum(y * scale + shift, 0.0)                            # [Cmid, M]

    # ---- 3x3 conv (pad=1): one tap-stacked matmul, then 9 lane rolls ----
    # p[k*Cout + co, m] = sum_c w2[co, c, dy, dx] * z[c, m]
    p = jnp.dot(w2s_ref[...], z, preferred_element_type=jnp.float32)   # [9*Cout, M]

    # Stage p into the lane-padded scratch; zero only the padded tail tile
    # (prevents NaN/Inf garbage reaching the masked accumulation), then
    # overwrite the [0, M) prefix.
    pad_start = (M // 128) * 128
    if M < Mp:
        pp_ref[:, pl.ds(pad_start, Mp - pad_start)] = jnp.zeros(
            (rows, Mp - pad_start), jnp.float32)
    pp_ref[:, pl.ds(0, M)] = p

    # out[co, m] = sum_k p[k*Cout+co, m + s_k] * mask_k[m]
    acc = jnp.zeros((Cout, Mp), jnp.float32)
    for k in range(9):
        dy, dx = divmod(k, 3)
        s = (dy - 1) * W + (dx - 1)                   # lane shift of this tap
        blk = pp_ref[pl.ds(k * Cout, Cout), :]        # [Cout, Mp] (aligned slice)
        if s == 0:
            shifted = blk
        else:
            # shifted[:, m] == blk[:, m + s]  (valid positions never wrap)
            shifted = pltpu.roll(blk, (-s) % Mp, 1)
        acc = acc + shifted * mask_ref[k]             # [1, Mp] broadcast
    o_ref[...] = acc[:, :M]


# ---------------------------------------------------------------------------
# Wrapper
# ---------------------------------------------------------------------------
@functools.partial(jax.jit, static_argnames=("eps",))
def forward(x_nchw, w1_oihw, gamma, beta, w2_oihw, eps=1e-5):
    N, Cin, H, W = x_nchw.shape
    Cmid = w1_oihw.shape[0]
    Cout = w2_oihw.shape[0]
    M = N * H * W
    Mp = ((M + 127) // 128) * 128

    # Channel-major views. For N == 1 the transpose moves a size-1 dim only,
    # so XLA treats it as a free reshape (no HBM relayout).
    x_cm = jnp.transpose(x_nchw, (1, 0, 2, 3)).reshape(Cin, M)
    w1_r = w1_oihw.reshape(Cmid, Cin)
    # tap-stacked 3x3 weights: [(dy*3+dx)*Cout + co, ci]
    w2s = jnp.transpose(w2_oihw, (2, 3, 0, 1)).reshape(9 * Cout, Cmid)

    # Per-tap validity masks (zero padding / row boundaries); constants under jit.
    hw = jnp.arange(H * W)
    h_idx, w_idx = hw // W, hw % W
    taps = []
    for dy in range(3):
        for dx in range(3):
            ok = ((h_idx + dy - 1 >= 0) & (h_idx + dy - 1 < H)
                  & (w_idx + dx - 1 >= 0) & (w_idx + dx - 1 < W))
            taps.append(jnp.tile(ok, N))
    mask = jnp.stack(taps).astype(jnp.float32)                 # [9, M]
    mask = jnp.pad(mask, ((0, 0), (0, Mp - M))).reshape(9, 1, Mp)

    kernel = functools.partial(fused_kernel, W=W, eps=eps)
    out_cm = pl.pallas_call(
        kernel,
        grid=(1,),
        in_specs=[
            pl.BlockSpec((Cin, M), lambda i: (0, 0)),
            pl.BlockSpec((Cmid, Cin), lambda i: (0, 0)),
            pl.BlockSpec((Cmid, 1), lambda i: (0, 0)),
            pl.BlockSpec((Cmid, 1), lambda i: (0, 0)),
            pl.BlockSpec((9 * Cout, Cmid), lambda i: (0, 0)),
            pl.BlockSpec((9, 1, Mp), lambda i: (0, 0, 0)),
        ],
        out_specs=pl.BlockSpec((Cout, M), lambda i: (0, 0)),
        out_shape=jax.ShapeDtypeStruct((Cout, M), jnp.float32),
        scratch_shapes=[pltpu.VMEM((9 * Cout, Mp), jnp.float32)],
        compiler_params=pltpu.CompilerParams(
            dimension_semantics=("arbitrary",)),
    )(x_cm, w1_r, gamma.reshape(Cmid, 1), beta.reshape(Cmid, 1), w2s, mask)

    # [Cout, N*H*W] -> [N, Cout, H, W]; free for N == 1.
    return jnp.transpose(out_cm.reshape(Cout, N, H, W), (1, 0, 2, 3))


# ---------------------------------------------------------------------------
# Pure-JAX reference (training-mode BN, biased variance)
# ---------------------------------------------------------------------------
def ref_forward(x, w1, gamma, beta, w2, eps=1e-5):
    x164 = jnp.maximum(x, 0.0)
    x165 = lax.conv_general_dilated(
        x164, w1, window_strides=(1, 1), padding="VALID",
        dimension_numbers=("NCHW", "OIHW", "NCHW"))
    mean = jnp.mean(x165, axis=(0, 2, 3))
    var = jnp.mean((x165 - mean[None, :, None, None]) ** 2, axis=(0, 2, 3))
    x166 = ((x165 - mean[None, :, None, None])
            / jnp.sqrt(var[None, :, None, None] + eps)
            * gamma[None, :, None, None] + beta[None, :, None, None])
    x167 = jnp.maximum(x166, 0.0)
    x168 = lax.conv_general_dilated(
        x167, w2, window_strides=(1, 1), padding=((1, 1), (1, 1)),
        dimension_numbers=("NCHW", "OIHW", "NCHW"))
    return x168


if __name__ == "__main__":
    key = jax.random.PRNGKey(0)
    k_x, k_w1, k_g, k_b, k_w2 = jax.random.split(key, 5)

    N, Cin, H, W = 1, 352, 14, 14
    Cmid, Cout = 128, 32

    x = jax.random.normal(k_x, (N, Cin, H, W), dtype=jnp.float32)
    w1 = jax.random.normal(k_w1, (Cmid, Cin, 1, 1), dtype=jnp.float32) * 0.05
    gamma = 1.0 + 0.1 * jax.random.normal(k_g, (Cmid,), dtype=jnp.float32)
    beta = 0.1 * jax.random.normal(k_b, (Cmid,), dtype=jnp.float32)
    w2 = jax.random.normal(k_w2, (Cout, Cmid, 3, 3), dtype=jnp.float32) * 0.05

    out = jax.block_until_ready(forward(x, w1, gamma, beta, w2))
    ref = jax.block_until_ready(ref_forward(x, w1, gamma, beta, w2))

    assert out.shape == (N, Cout, H, W), out.shape
    assert jnp.allclose(out, ref, atol=2e-3, rtol=2e-3), (
        float(jnp.max(jnp.abs(out - ref))))

    print("KERNEL_OK")
</pallas_src>

<mosaic_0001>
module attributes {stable_mosaic.version = 11 : i64} {
  func.func @fused_kernel(%arg0: i32, %arg1: memref<352x196xf32, #tpu.memory_space<vmem>>, %arg2: memref<128x352xf32, #tpu.memory_space<vmem>>, %arg3: memref<128x1xf32, #tpu.memory_space<vmem>>, %arg4: memref<128x1xf32, #tpu.memory_space<vmem>>, %arg5: memref<288x128xf32, #tpu.memory_space<vmem>>, %arg6: memref<9x1x256xf32, #tpu.memory_space<vmem>>, %arg7: memref<32x196xf32, #tpu.memory_space<vmem>>, %arg8: memref<288x256xf32, #tpu.memory_space<vmem>>) attributes {dimension_semantics = [#tpu.dimension_semantics<arbitrary>], iteration_bounds = array<i64: 1>, scalar_prefetch = 0 : i64, scratch_operands = 1 : i64, tpu.core_type = #tpu.core_type<tc>, window_params = [{pipeline_mode = #tpu.pipeline_mode<synchronous>, transform_indices = @transform_0, window_bounds = array<i64: 352, 196>}, {pipeline_mode = #tpu.pipeline_mode<synchronous>, transform_indices = @transform_1, window_bounds = array<i64: 128, 352>}, {pipeline_mode = #tpu.pipeline_mode<synchronous>, transform_indices = @transform_2, window_bounds = array<i64: 128, 1>}, {pipeline_mode = #tpu.pipeline_mode<synchronous>, transform_indices = @transform_3, window_bounds = array<i64: 128, 1>}, {pipeline_mode = #tpu.pipeline_mode<synchronous>, transform_indices = @transform_4, window_bounds = array<i64: 288, 128>}, {pipeline_mode = #tpu.pipeline_mode<synchronous>, transform_indices = @transform_5, window_bounds = array<i64: 9, 1, 256>}, {pipeline_mode = #tpu.pipeline_mode<synchronous>, transform_indices = @transform_6, window_bounds = array<i64: 32, 196>}]} {
    %c0 = arith.constant 0 : index
    %c0_0 = arith.constant 0 : index
    %0 = vector.load %arg1[%c0, %c0_0] : memref<352x196xf32, #tpu.memory_space<vmem>>, vector<352x196xf32>
    %cst = arith.constant 0.000000e+00 : f32
    %1 = vector.broadcast %cst : f32 to vector<352x196xf32>
    %2 = arith.maximumf %0, %1 : vector<352x196xf32>
    %c0_1 = arith.constant 0 : index
    %c0_2 = arith.constant 0 : index
    %3 = vector.load %arg2[%c0_1, %c0_2] : memref<128x352xf32, #tpu.memory_space<vmem>>, vector<128x352xf32>
    %cst_3 = arith.constant dense<0.000000e+00> : vector<128x196xf32>
    %4 = tpu.matmul %3, %2, %cst_3 {dimension_numbers = #tpu.dot_dimension_numbers<[1], [0], [0], [1], [0, 0, 1, 1], [], []>} : vector<128x352xf32>, vector<352x196xf32>, vector<128x196xf32> -> vector<128x196xf32>
    %cst_4 = arith.constant dense<0.000000e+00> : vector<128xf32>
    %5 = vector.multi_reduction <add>, %4, %cst_4 [1] : vector<128x196xf32> to vector<128xf32>
    %6 = vector.shape_cast %5 : vector<128xf32> to vector<128x1xf32>
    %cst_5 = arith.constant 1.960000e+02 : f32
    %7 = vector.broadcast %cst_5 : f32 to vector<128x1xf32>
    %8 = arith.divf %6, %7 : vector<128x1xf32>
    %9 = vector.broadcast %8 : vector<128x1xf32> to vector<128x196xf32>
    %10 = arith.subf %4, %9 : vector<128x196xf32>
    %11 = arith.mulf %10, %10 : vector<128x196xf32>
    %cst_6 = arith.constant dense<0.000000e+00> : vector<128xf32>
    %12 = vector.multi_reduction <add>, %11, %cst_6 [1] : vector<128x196xf32> to vector<128xf32>
    %13 = vector.shape_cast %12 : vector<128xf32> to vector<128x1xf32>
    %cst_7 = arith.constant 1.960000e+02 : f32
    %14 = vector.broadcast %cst_7 : f32 to vector<128x1xf32>
    %15 = arith.divf %13, %14 : vector<128x1xf32>
    %c0_8 = arith.constant 0 : index
    %c0_9 = arith.constant 0 : index
    %16 = vector.load %arg3[%c0_8, %c0_9] : memref<128x1xf32, #tpu.memory_space<vmem>>, vector<128x1xf32>
    %cst_10 = arith.constant 9.99999974E-6 : f32
    %17 = vector.broadcast %cst_10 : f32 to vector<128x1xf32>
    %18 = arith.addf %15, %17 : vector<128x1xf32>
    %19 = math.rsqrt %18 : vector<128x1xf32>
    %20 = arith.mulf %16, %19 : vector<128x1xf32>
    %c0_11 = arith.constant 0 : index
    %c0_12 = arith.constant 0 : index
    %21 = vector.load %arg4[%c0_11, %c0_12] : memref<128x1xf32, #tpu.memory_space<vmem>>, vector<128x1xf32>
    %22 = arith.mulf %8, %20 : vector<128x1xf32>
    %23 = arith.subf %21, %22 : vector<128x1xf32>
    %24 = vector.broadcast %20 : vector<128x1xf32> to vector<128x196xf32>
    %25 = arith.mulf %4, %24 : vector<128x196xf32>
    %26 = vector.broadcast %23 : vector<128x1xf32> to vector<128x196xf32>
    %27 = arith.addf %25, %26 : vector<128x196xf32>
    %cst_13 = arith.constant 0.000000e+00 : f32
    %28 = vector.broadcast %cst_13 : f32 to vector<128x196xf32>
    %29 = arith.maximumf %27, %28 : vector<128x196xf32>
    %c0_14 = arith.constant 0 : index
    %c0_15 = arith.constant 0 : index
    %30 = vector.load %arg5[%c0_14, %c0_15] : memref<288x128xf32, #tpu.memory_space<vmem>>, vector<288x128xf32>
    %cst_16 = arith.constant dense<0.000000e+00> : vector<288x196xf32>
    %31 = tpu.matmul %30, %29, %cst_16 {dimension_numbers = #tpu.dot_dimension_numbers<[1], [0], [0], [1], [0, 0, 1, 1], [], []>} : vector<288x128xf32>, vector<128x196xf32>, vector<288x196xf32> -> vector<288x196xf32>
    %cst_17 = arith.constant 0.000000e+00 : f32
    %32 = vector.broadcast %cst_17 : f32 to vector<288x128xf32>
    %c0_18 = arith.constant 0 : index
    %c128 = arith.constant 128 : index
    %33 = vector.load %arg8[%c0_18, %c128] : memref<288x256xf32, #tpu.memory_space<vmem>>, vector<288x128xf32>
    tpu.vector_store %arg8[%c0_18, %c128], %32 {strides = array<i32>} : memref<288x256xf32, #tpu.memory_space<vmem>>, vector<288x128xf32>,
    %c0_19 = arith.constant 0 : index
    %c0_20 = arith.constant 0 : index
    %34 = vector.load %arg8[%c0_19, %c0_20] : memref<288x256xf32, #tpu.memory_space<vmem>>, vector<288x196xf32>
    tpu.vector_store %arg8[%c0_19, %c0_20], %31 {strides = array<i32>} : memref<288x256xf32, #tpu.memory_space<vmem>>, vector<288x196xf32>,
    %cst_21 = arith.constant 0.000000e+00 : f32
    %35 = vector.broadcast %cst_21 : f32 to vector<32x256xf32>
    %c0_22 = arith.constant 0 : index
    %c0_23 = arith.constant 0 : index
    %36 = vector.load %arg8[%c0_22, %c0_23] : memref<288x256xf32, #tpu.memory_space<vmem>>, vector<32x256xf32>
    %c15_i32 = arith.constant 15 : i32
    %37 = tpu.dynamic_rotate %36 by %c15_i32 dim 1 : vector<32x256xf32>, i32 -> vector<32x256xf32>
    %c0_24 = arith.constant 0 : index
    %c0_25 = arith.constant 0 : index
    %c0_26 = arith.constant 0 : index
    %38 = vector.load %arg6[%c0_24, %c0_25, %c0_26] : memref<9x1x256xf32, #tpu.memory_space<vmem>>, vector<1x1x256xf32>
    %39 = vector.shape_cast %38 : vector<1x1x256xf32> to vector<1x256xf32>
    %40 = vector.broadcast %39 : vector<1x256xf32> to vector<32x256xf32>
    %41 = arith.mulf %37, %40 : vector<32x256xf32>
    %42 = arith.addf %35, %41 : vector<32x256xf32>
    %c32 = arith.constant 32 : index
    %c0_27 = arith.constant 0 : index
    %43 = vector.load %arg8[%c32, %c0_27] : memref<288x256xf32, #tpu.memory_space<vmem>>, vector<32x256xf32>
    %c14_i32 = arith.constant 14 : i32
    %44 = tpu.dynamic_rotate %43 by %c14_i32 dim 1 : vector<32x256xf32>, i32 -> vector<32x256xf32>
    %c1 = arith.constant 1 : index
    %c0_28 = arith.constant 0 : index
    %c0_29 = arith.constant 0 : index
    %45 = vector.load %arg6[%c1, %c0_28, %c0_29] : memref<9x1x256xf32, #tpu.memory_space<vmem>>, vector<1x1x256xf32>
    %46 = vector.shape_cast %45 : vector<1x1x256xf32> to vector<1x256xf32>
    %47 = vector.broadcast %46 : vector<1x256xf32> to vector<32x256xf32>
    %48 = arith.mulf %44, %47 : vector<32x256xf32>
    %49 = arith.addf %42, %48 : vector<32x256xf32>
    %c64 = arith.constant 64 : index
    %c0_30 = arith.constant 0 : index
    %50 = vector.load %arg8[%c64, %c0_30] : memref<288x256xf32, #tpu.memory_space<vmem>>, vector<32x256xf32>
    %c13_i32 = arith.constant 13 : i32
    %51 = tpu.dynamic_rotate %50 by %c13_i32 dim 1 : vector<32x256xf32>, i32 -> vector<32x256xf32>
    %c2 = arith.constant 2 : index
    %c0_31 = arith.constant 0 : index
    %c0_32 = arith.constant 0 : index
    %52 = vector.load %arg6[%c2, %c0_31, %c0_32] : memref<9x1x256xf32, #tpu.memory_space<vmem>>, vector<1x1x256xf32>
    %53 = vector.shape_cast %52 : vector<1x1x256xf32> to vector<1x256xf32>
    %54 = vector.broadcast %53 : vector<1x256xf32> to vector<32x256xf32>
    %55 = arith.mulf %51, %54 : vector<32x256xf32>
    %56 = arith.addf %49, %55 : vector<32x256xf32>
    %c96 = arith.constant 96 : index
    %c0_33 = arith.constant 0 : index
    %57 = vector.load %arg8[%c96, %c0_33] : memref<288x256xf32, #tpu.memory_space<vmem>>, vector<32x256xf32>
    %c1_i32 = arith.constant 1 : i32
    %58 = tpu.dynamic_rotate %57 by %c1_i32 dim 1 : vector<32x256xf32>, i32 -> vector<32x256xf32>
    %c3 = arith.constant 3 : index
    %c0_34 = arith.constant 0 : index
    %c0_35 = arith.constant 0 : index
    %59 = vector.load %arg6[%c3, %c0_34, %c0_35] : memref<9x1x256xf32, #tpu.memory_space<vmem>>, vector<1x1x256xf32>
    %60 = vector.shape_cast %59 : vector<1x1x256xf32> to vector<1x256xf32>
    %61 = vector.broadcast %60 : vector<1x256xf32> to vector<32x256xf32>
    %62 = arith.mulf %58, %61 : vector<32x256xf32>
    %63 = arith.addf %56, %62 : vector<32x256xf32>
    %c128_36 = arith.constant 128 : index
    %c0_37 = arith.constant 0 : index
    %64 = vector.load %arg8[%c128_36, %c0_37] : memref<288x256xf32, #tpu.memory_space<vmem>>, vector<32x256xf32>
    %c4 = arith.constant 4 : index
    %c0_38 = arith.constant 0 : index
    %c0_39 = arith.constant 0 : index
    %65 = vector.load %arg6[%c4, %c0_38, %c0_39] : memref<9x1x256xf32, #tpu.memory_space<vmem>>, vector<1x1x256xf32>
    %66 = vector.shape_cast %65 : vector<1x1x256xf32> to vector<1x256xf32>
    %67 = vector.broadcast %66 : vector<1x256xf32> to vector<32x256xf32>
    %68 = arith.mulf %64, %67 : vector<32x256xf32>
    %69 = arith.addf %63, %68 : vector<32x256xf32>
    %c160 = arith.constant 160 : index
    %c0_40 = arith.constant 0 : index
    %70 = vector.load %arg8[%c160, %c0_40] : memref<288x256xf32, #tpu.memory_space<vmem>>, vector<32x256xf32>
    %c255_i32 = arith.constant 255 : i32
    %71 = tpu.dynamic_rotate %70 by %c255_i32 dim 1 : vector<32x256xf32>, i32 -> vector<32x256xf32>
    %c5 = arith.constant 5 : index
    %c0_41 = arith.constant 0 : index
    %c0_42 = arith.constant 0 : index
    %72 = vector.load %arg6[%c5, %c0_41, %c0_42] : memref<9x1x256xf32, #tpu.memory_space<vmem>>, vector<1x1x256xf32>
    %73 = vector.shape_cast %72 : vector<1x1x256xf32> to vector<1x256xf32>
    %74 = vector.broadcast %73 : vector<1x256xf32> to vector<32x256xf32>
    %75 = arith.mulf %71, %74 : vector<32x256xf32>
    %76 = arith.addf %69, %75 : vector<32x256xf32>
    %c192 = arith.constant 192 : index
    %c0_43 = arith.constant 0 : index
    %77 = vector.load %arg8[%c192, %c0_43] : memref<288x256xf32, #tpu.memory_space<vmem>>, vector<32x256xf32>
    %c243_i32 = arith.constant 243 : i32
    %78 = tpu.dynamic_rotate %77 by %c243_i32 dim 1 : vector<32x256xf32>, i32 -> vector<32x256xf32>
    %c6 = arith.constant 6 : index
    %c0_44 = arith.constant 0 : index
    %c0_45 = arith.constant 0 : index
    %79 = vector.load %arg6[%c6, %c0_44, %c0_45] : memref<9x1x256xf32, #tpu.memory_space<vmem>>, vector<1x1x256xf32>
    %80 = vector.shape_cast %79 : vector<1x1x256xf32> to vector<1x256xf32>
    %81 = vector.broadcast %80 : vector<1x256xf32> to vector<32x256xf32>
    %82 = arith.mulf %78, %81 : vector<32x256xf32>
    %83 = arith.addf %76, %82 : vector<32x256xf32>
    %c224 = arith.constant 224 : index
    %c0_46 = arith.constant 0 : index
    %84 = vector.load %arg8[%c224, %c0_46] : memref<288x256xf32, #tpu.memory_space<vmem>>, vector<32x256xf32>
    %c242_i32 = arith.constant 242 : i32
    %85 = tpu.dynamic_rotate %84 by %c242_i32 dim 1 : vector<32x256xf32>, i32 -> vector<32x256xf32>
    %c7 = arith.constant 7 : index
    %c0_47 = arith.constant 0 : index
    %c0_48 = arith.constant 0 : index
    %86 = vector.load %arg6[%c7, %c0_47, %c0_48] : memref<9x1x256xf32, #tpu.memory_space<vmem>>, vector<1x1x256xf32>
    %87 = vector.shape_cast %86 : vector<1x1x256xf32> to vector<1x256xf32>
    %88 = vector.broadcast %87 : vector<1x256xf32> to vector<32x256xf32>
    %89 = arith.mulf %85, %88 : vector<32x256xf32>
    %90 = arith.addf %83, %89 : vector<32x256xf32>
    %c256 = arith.constant 256 : index
    %c0_49 = arith.constant 0 : index
    %91 = vector.load %arg8[%c256, %c0_49] : memref<288x256xf32, #tpu.memory_space<vmem>>, vector<32x256xf32>
    %c241_i32 = arith.constant 241 : i32
    %92 = tpu.dynamic_rotate %91 by %c241_i32 dim 1 : vector<32x256xf32>, i32 -> vector<32x256xf32>
    %c8 = arith.constant 8 : index
    %c0_50 = arith.constant 0 : index
    %c0_51 = arith.constant 0 : index
    %93 = vector.load %arg6[%c8, %c0_50, %c0_51] : memref<9x1x256xf32, #tpu.memory_space<vmem>>, vector<1x1x256xf32>
    %94 = vector.shape_cast %93 : vector<1x1x256xf32> to vector<1x256xf32>
    %95 = vector.broadcast %94 : vector<1x256xf32> to vector<32x256xf32>
    %96 = arith.mulf %92, %95 : vector<32x256xf32>
    %97 = arith.addf %90, %96 : vector<32x256xf32>
    %98 = vector.extract_strided_slice %97 {offsets = [0, 0], sizes = [32, 196], strides = [1, 1]} : vector<32x256xf32> to vector<32x196xf32>
    %c0_52 = arith.constant 0 : index
    %c0_53 = arith.constant 0 : index
    %99 = vector.load %arg7[%c0_52, %c0_53] : memref<32x196xf32, #tpu.memory_space<vmem>>, vector<32x196xf32>
    tpu.vector_store %arg7[%c0_52, %c0_53], %98 {strides = array<i32>} : memref<32x196xf32, #tpu.memory_space<vmem>>, vector<32x196xf32>,
    return
  }
  func.func @transform_0(%arg0: i32) -> (i32, i32) {
    %c0_i32 = arith.constant 0 : i32
    %c0_i32_0 = arith.constant 0 : i32
    %c0_i32_1 = arith.constant 0 : i32
    return %c0_i32, %c0_i32_0 : i32, i32
  }
  func.func @transform_1(%arg0: i32) -> (i32, i32) {
    %c0_i32 = arith.constant 0 : i32
    %c0_i32_0 = arith.constant 0 : i32
    %c0_i32_1 = arith.constant 0 : i32
    return %c0_i32, %c0_i32_0 : i32, i32
  }
  func.func @transform_2(%arg0: i32) -> (i32, i32) {
    %c0_i32 = arith.constant 0 : i32
    %c0_i32_0 = arith.constant 0 : i32
    %c0_i32_1 = arith.constant 0 : i32
    return %c0_i32, %c0_i32_0 : i32, i32
  }
  func.func @transform_3(%arg0: i32) -> (i32, i32) {
    %c0_i32 = arith.constant 0 : i32
    %c0_i32_0 = arith.constant 0 : i32
    %c0_i32_1 = arith.constant 0 : i32
    return %c0_i32, %c0_i32_0 : i32, i32
  }
  func.func @transform_4(%arg0: i32) -> (i32, i32) {
    %c0_i32 = arith.constant 0 : i32
    %c0_i32_0 = arith.constant 0 : i32
    %c0_i32_1 = arith.constant 0 : i32
    return %c0_i32, %c0_i32_0 : i32, i32
  }
  func.func @transform_5(%arg0: i32) -> (i32, i32, i32) {
    %c0_i32 = arith.constant 0 : i32
    %c0_i32_0 = arith.constant 0 : i32
    %c0_i32_1 = arith.constant 0 : i32
    %c0_i32_2 = arith.constant 0 : i32
    return %c0_i32, %c0_i32_0, %c0_i32_1 : i32, i32, i32
  }
  func.func @transform_6(%arg0: i32) -> (i32, i32) {
    %c0_i32 = arith.constant 0 : i32
    %c0_i32_0 = arith.constant 0 : i32
    %c0_i32_1 = arith.constant 0 : i32
    return %c0_i32, %c0_i32_0 : i32, i32
  }
}

</mosaic_0001>

<bundles_post_ra>
// kernel: forward.1
= control target key start
LH: loop header
LB: loop body
LE: loop exit
PB: predicated region body
PF: predicated region fallthrough
CT: control target
= control target key end

     0   :  { %v2284_v3 = vmov 0.0   ;;  %vm247_vm0 = vcmask 785408   ;;  %vm618_vm1 = vcmask 556032   ;;  %s2286_s24 = smov 1   ;;  %s2289_s25 = smov 127   ;;  %s3905_s0 = inlined_call_operand.vmem [shape: f32[352,196], index: 0, kind: input, shape index: {}]   ;;  %s3906_s1 = inlined_call_operand.vmem [shape: f32[128,352], index: 1, kind: input, shape index: {}]   ;;  %s3907_s2 = inlined_call_operand.vmem [shape: f32[128,1], index: 2, kind: input, shape index: {}]   ;;  %s3908_s3 = inlined_call_operand.vmem [shape: f32[128,1], index: 3, kind: input, shape index: {}]   ;;  %s3909_s4 = inlined_call_operand.vmem [shape: f32[288,128], index: 4, kind: input, shape index: {}]   ;;  %s3910_s5 = inlined_call_operand.vmem [shape: f32[9,1,256], index: 5, kind: input, shape index: {}]   ;;  %s3911_s6 = inlined_call_operand.vmem [shape: f32[32,196], index: 6, kind: output, shape index: {}]  }
   0x1   :  { %v54_v0 = vld [vmem:[%s3905_s0 + $0xf8] sm:$0xff]  ;;  %v53_v1 = vld [vmem:[%s3905_s0 + $0xf0] sm:$0xff]  ;;  %v52_v2 = vld [vmem:[%s3905_s0 + $0xe8] sm:$0xff]  ;;  %521 = vmatprep.mubr.f32.mxu1 %v2284_v3  ;;  %1529 = vst [vmem:[#allocation2 + $0x8] sm:$0xff] %v2284_v3  ;;  %s2290_s26 = smov 13   ;;  %s2291_s27 = smov 115  }
   0x2   :  { %1530 = vst [vmem:[#allocation2 + $0x18] sm:$0xff] %v2284_v3  ;;  %1531 = vst [vmem:[#allocation2 + $0x28] sm:$0xff] %v2284_v3  ;;  %v142_v4 = vmax.f32 %v54_v0, 0.0  ;;  %v141_v5 = vmax.f32 %v53_v1, 0.0  ;;  %v140_v6 = vmax.f32 %v52_v2, 0.0  ;;  %v51_v7 = vld [vmem:[%s3905_s0 + $0xe0] sm:$0xff] }
   0x3   :  { %1532 = vst [vmem:[#allocation2 + $0x38] sm:$0xff] %v2284_v3  ;;  %1533 = vst [vmem:[#allocation2 + $0x48] sm:$0xff] %v2284_v3  ;;  %v50_v8 = vld [vmem:[%s3905_s0 + $0xd8] sm:$0xff]  ;;  %v49_v9 = vld [vmem:[%s3905_s0 + $0xd0] sm:$0xff]  ;;  %v139_v10 = vmax.f32 %v51_v7, 0.0  ;;  %s2292_s28 = smov 114  }
   0x4   :  { %1534 = vst [vmem:[#allocation2 + $0x58] sm:$0xff] %v2284_v3  ;;  %1535 = vst [vmem:[#allocation2 + $0x68] sm:$0xff] %v2284_v3  ;;  %v48_v11 = vld [vmem:[%s3905_s0 + $0xc8] sm:$0xff]  ;;  %296 = vmatprep.subr.mxu0 %v142_v4  ;;  %v138_v12 = vmax.f32 %v50_v8, 0.0  ;;  %v47_v13 = vld [vmem:[%s3905_s0 + $0xc0] sm:$0xff]  ;;  %v137_v14 = vmax.f32 %v49_v9, 0.0 }
   0x5   :  { %1536 = vst [vmem:[#allocation2 + $0x78] sm:$0xff] %v2284_v3  ;;  %1537 = vst [vmem:[#allocation2 + $0x88] sm:$0xff] %v2284_v3  ;;  %297 = vmatpush1.msra.mxu0 %v141_v5  ;;  %v46_v15 = vld [vmem:[%s3905_s0 + $0xb8] sm:$0xff]  ;;  %v136_v16 = vmax.f32 %v48_v11, 0.0  ;;  %v45_v17 = vld [vmem:[%s3905_s0 + $0xb0] sm:$0xff]  ;;  %v135_v18 = vmax.f32 %v47_v13, 0.0 }
   0x6   :  { %1538 = vst [vmem:[#allocation2 + $0x98] sm:$0xff] %v2284_v3  ;;  %1539 = vst [vmem:[#allocation2 + $0xa8] sm:$0xff] %v2284_v3  ;;  %298 = vmatprep.subr.mxu0 %v140_v6  ;;  %v44_v19 = vld [vmem:[%s3905_s0 + $0xa8] sm:$0xff]  ;;  %v134_v20 = vmax.f32 %v46_v15, 0.0  ;;  %v43_v21 = vld [vmem:[%s3905_s0 + $0xa0] sm:$0xff]  ;;  %v133_v22 = vmax.f32 %v45_v17, 0.0 }
   0x7   :  { %1540 = vst [vmem:[#allocation2 + $0xb8] sm:$0xff] %v2284_v3  ;;  %1541 = vst [vmem:[#allocation2 + $0xc8] sm:$0xff] %v2284_v3  ;;  %299 = vmatpush1.msra.mxu0 %v139_v10  ;;  %v42_v23 = vld [vmem:[%s3905_s0 + $0x98] sm:$0xff]  ;;  %v132_v24 = vmax.f32 %v44_v19, 0.0  ;;  %v41_v25 = vld [vmem:[%s3905_s0 + $0x90] sm:$0xff]  ;;  %v131_v26 = vmax.f32 %v43_v21, 0.0 }
   0x8   :  { %1542 = vst [vmem:[#allocation2 + $0xd8] sm:$0xff] %v2284_v3  ;;  %1543 = vst [vmem:[#allocation2 + $0xe8] sm:$0xff] %v2284_v3  ;;  %300 = vmatprep.subr.mxu0 %v138_v12  ;;  %v40_v27 = vld [vmem:[%s3905_s0 + $0x88] sm:$0xff]  ;;  %v130_v28 = vmax.f32 %v42_v23, 0.0  ;;  %v39_v29 = vld [vmem:[%s3905_s0 + $0x80] sm:$0xff]  ;;  %v129_v30 = vmax.f32 %v41_v25, 0.0 }
   0x9   :  { %1544 = vst [vmem:[#allocation2 + $0xf8] sm:$0xff] %v2284_v3  ;;  %1545 = vst [vmem:[#allocation2 + $0x108] sm:$0xff] %v2284_v3  ;;  %301 = vmatpush1.msra.mxu0 %v137_v14  ;;  %v38_v31 = vld [vmem:[%s3905_s0 + $0x78] sm:$0xff]  ;;  %v128_v32 = vmax.f32 %v40_v27, 0.0  ;;  %v37_v33 = vld [vmem:[%s3905_s0 + $0x70] sm:$0xff]  ;;  %v127_v36 = vmax.f32 %v39_v29, 0.0 }
   0xa   :  { %1546 = vst [vmem:[#allocation2 + $0x118] sm:$0xff] %v2284_v3  ;;  %1547 = vst [vmem:[#allocation2 + $0x128] sm:$0xff] %v2284_v3  ;;  %302 = vmatprep.subr.mxu0 %v136_v16  ;;  %v110_v34 = vld [vmem:[%s3905_s0 + $0x2b8] sm:$0xff]  ;;  %v109_v35 = vld [vmem:[%s3905_s0 + $0x2b0] sm:$0xff]  ;;  %v126_v41 = vmax.f32 %v38_v31, 0.0  ;;  %v125_v46 = vmax.f32 %v37_v33, 0.0 }
   0xb   :  { %1548 = vst [vmem:[#allocation2 + $0x138] sm:$0xff] %v2284_v3  ;;  %1549 = vst [vmem:[#allocation2 + $0x148] sm:$0xff] %v2284_v3  ;;  %303 = vmatpush1.msra.mxu0 %v135_v18  ;;  %v36_v37 = vld [vmem:[%s3905_s0 + $0x68] sm:$0xff]  ;;  %v198_v38 = vmax.f32 %v110_v34, 0.0  ;;  %v197_v39 = vmax.f32 %v109_v35, 0.0  ;;  %v35_v42 = vld [vmem:[%s3905_s0 + $0x60] sm:$0xff] }
   0xc   :  { %1550 = vst [vmem:[#allocation2 + $0x158] sm:$0xff] %v2284_v3  ;;  %1551 = vst [vmem:[#allocation2 + $0x168] sm:$0xff] %v2284_v3  ;;  %304 = vmatprep.subr.mxu0 %v134_v20  ;;  %v108_v40 = vld [vmem:[%s3905_s0 + $0x2a8] sm:$0xff]  ;;  %v107_v44 = vld [vmem:[%s3905_s0 + $0x2a0] sm:$0xff]  ;;  %v124_v51 = vmax.f32 %v36_v37, 0.0  ;;  %v123_v56 = vmax.f32 %v35_v42, 0.0 }
   0xd   :  { %1552 = vst [vmem:[#allocation2 + $0x178] sm:$0xff] %v2284_v3  ;;  %1553 = vst [vmem:[#allocation2 + $0x188] sm:$0xff] %v2284_v3  ;;  %305 = vmatpush1.msra.mxu0 %v133_v22  ;;  %v196_v43 = vmax.f32 %v108_v40, 0.0  ;;  %v106_v45 = vld [vmem:[%s3905_s0 + $0x298] sm:$0xff]  ;;  %465 = vmatprep.subr.mxu1 %v198_v38  ;;  %v195_v48 = vmax.f32 %v107_v44, 0.0  ;;  %v105_v50 = vld [vmem:[%s3905_s0 + $0x290] sm:$0xff] }
   0xe   :  { %1554 = vst [vmem:[#allocation2 + $0x198] sm:$0xff] %v2284_v3  ;;  %1555 = vst [vmem:[#allocation2 + $0x1a8] sm:$0xff] %v2284_v3  ;;  %306 = vmatprep.subr.mxu0 %v132_v24  ;;  %v34_v47 = vld [vmem:[%s3905_s0 + $0x58] sm:$0xff]  ;;  %v194_v49 = vmax.f32 %v106_v45, 0.0  ;;  %v33_v52 = vld [vmem:[%s3905_s0 + $0x50] sm:$0xff]  ;;  %466 = vmatpush1.msra.mxu1 %v197_v39  ;;  %v193_v53 = vmax.f32 %v105_v50, 0.0 }
   0xf   :  { %1556 = vst [vmem:[#allocation2 + $0x1b8] sm:$0xff] %v2284_v3  ;;  %1557 = vst [vmem:[#allocation2 + $0x1c8] sm:$0xff] %v2284_v3  ;;  %307 = vmatpush1.msra.mxu0 %v131_v26  ;;  %v104_v54 = vld [vmem:[%s3905_s0 + $0x288] sm:$0xff]  ;;  %v103_v55 = vld [vmem:[%s3905_s0 + $0x280] sm:$0xff]  ;;  %467 = vmatprep.subr.mxu1 %v196_v43  ;;  %v122_v60 = vmax.f32 %v34_v47, 0.0  ;;  %v121_v1 = vmax.f32 %v33_v52, 0.0 }
  0x10   :  { %1558 = vst [vmem:[#allocation2 + $0x1d8] sm:$0xff] %v2284_v3  ;;  %1559 = vst [vmem:[#allocation2 + $0x1e8] sm:$0xff] %v2284_v3  ;;  %308 = vmatprep.subr.mxu0 %v130_v28  ;;  %v32_v57 = vld [vmem:[%s3905_s0 + $0x48] sm:$0xff]  ;;  %v192_v58 = vmax.f32 %v104_v54, 0.0  ;;  %v102_v59 = vld [vmem:[%s3905_s0 + $0x278] sm:$0xff]  ;;  %468 = vmatpush1.msra.mxu1 %v195_v48  ;;  %v191_v62 = vmax.f32 %v103_v55, 0.0 }
  0x11   :  { %1560 = vst [vmem:[#allocation2 + $0x1f8] sm:$0xff] %v2284_v3  ;;  %1561 = vst [vmem:[#allocation2 + $0x208] sm:$0xff] %v2284_v3  ;;  %309 = vmatpush1.msra.mxu0 %v129_v30  ;;  %v31_v61 = vld [vmem:[%s3905_s0 + $0x40] sm:$0xff]  ;;  %v101_v63 = vld [vmem:[%s3905_s0 + $0x270] sm:$0xff]  ;;  %469 = vmatprep.subr.mxu1 %v194_v49  ;;  %v190_v4 = vmax.f32 %v102_v59, 0.0  ;;  %v120_v6 = vmax.f32 %v32_v57, 0.0 }
  0x12   :  { %1562 = vst [vmem:[#allocation2 + $0x218] sm:$0xff] %v2284_v3  ;;  %1563 = vst [vmem:[#allocation2 + $0x228] sm:$0xff] %v2284_v3  ;;  %310 = vmatprep.subr.mxu0 %v128_v32  ;;  %v100_v0 = vld [vmem:[%s3905_s0 + $0x268] sm:$0xff]  ;;  %v30_v2 = vld [vmem:[%s3905_s0 + $0x38] sm:$0xff]  ;;  %470 = vmatpush1.msra.mxu1 %v193_v53  ;;  %v189_v8 = vmax.f32 %v101_v63, 0.0  ;;  %v119_v10 = vmax.f32 %v31_v61, 0.0 }
  0x13   :  { %1564 = vst [vmem:[#allocation2 + $0x238] sm:$0xff] %v2284_v3  ;;  %311 = vmatpush1.msra.mxu0 %v127_v36  ;;  %v99_v5 = vld [vmem:[%s3905_s0 + $0x260] sm:$0xff]  ;;  %v29_v7 = vld [vmem:[%s3905_s0 + $0x30] sm:$0xff]  ;;  %v98_v9 = vld [vmem:[%s3905_s0 + $0x258] sm:$0xff]  ;;  %471 = vmatprep.subr.mxu1 %v192_v58  ;;  %v188_v12 = vmax.f32 %v100_v0, 0.0  ;;  %v118_v14 = vmax.f32 %v30_v2, 0.0 }
  0x14   :  { %312 = vmatprep.subr.mxu0 %v126_v41  ;;  %v28_v11 = vld [vmem:[%s3905_s0 + $0x28] sm:$0xff]  ;;  %v97_v13 = vld [vmem:[%s3905_s0 + $0x250] sm:$0xff]  ;;  %v27_v15 = vld [vmem:[%s3905_s0 + $0x20] sm:$0xff]  ;;  %472 = vmatpush1.msra.mxu1 %v191_v62  ;;  %v187_v16 = vmax.f32 %v99_v5, 0.0  ;;  %v117_v18 = vmax.f32 %v29_v7, 0.0  ;;  %v186_v20 = vmax.f32 %v98_v9, 0.0 }
  0x15   :  { %313 = vmatpush1.msra.mxu0 %v125_v46  ;;  %v96_v17 = vld [vmem:[%s3905_s0 + $0x248] sm:$0xff]  ;;  %v26_v19 = vld [vmem:[%s3905_s0 + $0x18] sm:$0xff]  ;;  %473 = vmatprep.subr.mxu1 %v190_v4  ;;  %v95_v21 = vld [vmem:[%s3905_s0 + $0x240] sm:$0xff]  ;;  %v116_v22 = vmax.f32 %v28_v11, 0.0  ;;  %v185_v24 = vmax.f32 %v97_v13, 0.0  ;;  %v115_v26 = vmax.f32 %v27_v15, 0.0 }
  0x16   :  { %314 = vmatprep.subr.mxu0 %v124_v51  ;;  %v25_v23 = vld [vmem:[%s3905_s0 + $0x10] sm:$0xff]  ;;  %474 = vmatpush1.msra.mxu1 %v189_v8  ;;  %v94_v25 = vld [vmem:[%s3905_s0 + $0x238] sm:$0xff]  ;;  %v24_v27 = vld [vmem:[%s3905_s0 + $0x8] sm:$0xff]  ;;  %v184_v28 = vmax.f32 %v96_v17, 0.0  ;;  %v114_v30 = vmax.f32 %v26_v19, 0.0  ;;  %v183_v32 = vmax.f32 %v95_v21, 0.0 }
  0x17   :  { %315 = vmatpush1.msra.mxu0 %v123_v56  ;;  %475 = vmatprep.subr.mxu1 %v188_v12  ;;  %v93_v29 = vld [vmem:[%s3905_s0 + $0x230] sm:$0xff]  ;;  %v23_v31 = vld [vmem:[%s3905_s0] sm:$0xff]  ;;  %v92_v33 = vld [vmem:[%s3905_s0 + $0x228] sm:$0xff]  ;;  %v113_v34 = vmax.f32 %v25_v23, 0.0  ;;  %v182_v36 = vmax.f32 %v94_v25, 0.0  ;;  %v112_v38 = vmax.f32 %v24_v27, 0.0 }
  0x18   :  { %316 = vmatprep.subr.mxu0 %v122_v60  ;;  %476 = vmatpush1.msra.mxu1 %v187_v16  ;;  %v86_v35 = vld [vmem:[%s3905_s0 + $0x1f8] sm:$0xff]  ;;  %v91_v37 = vld [vmem:[%s3905_s0 + $0x220] sm:$0xff]  ;;  %v85_v39 = vld [vmem:[%s3905_s0 + $0x1f0] sm:$0xff]  ;;  %v181_v40 = vmax.f32 %v93_v29, 0.0  ;;  %v111_v42 = vmax.f32 %v23_v31, 0.0  ;;  %v180_v44 = vmax.f32 %v92_v33, 0.0 }
  0x19   :  { %317 = vmatpush1.msra.mxu0 %v121_v1  ;;  %477 = vmatprep.subr.mxu1 %v186_v20  ;;  %v90_v41 = vld [vmem:[%s3905_s0 + $0x218] sm:$0xff]  ;;  %v84_v43 = vld [vmem:[%s3905_s0 + $0x1e8] sm:$0xff]  ;;  %v89_v45 = vld [vmem:[%s3905_s0 + $0x210] sm:$0xff]  ;;  %v174_v46 = vmax.f32 %v86_v35, 0.0  ;;  %v179_v48 = vmax.f32 %v91_v37, 0.0  ;;  %v173_v50 = vmax.f32 %v85_v39, 0.0 }
  0x1a   :  { %318 = vmatprep.subr.mxu0 %v120_v6  ;;  %478 = vmatpush1.msra.mxu1 %v185_v24  ;;  %v83_v47 = vld [vmem:[%s3905_s0 + $0x1e0] sm:$0xff]  ;;  %v88_v49 = vld [vmem:[%s3905_s0 + $0x208] sm:$0xff]  ;;  %v82_v51 = vld [vmem:[%s3905_s0 + $0x1d8] sm:$0xff]  ;;  %v178_v52 = vmax.f32 %v90_v41, 0.0  ;;  %v172_v54 = vmax.f32 %v84_v43, 0.0  ;;  %v177_v56 = vmax.f32 %v89_v45, 0.0 }
  0x1b   :  { %319 = vmatpush1.msra.mxu0 %v119_v10  ;;  %479 = vmatprep.subr.mxu1 %v184_v28  ;;  %v87_v53 = vld [vmem:[%s3905_s0 + $0x200] sm:$0xff]  ;;  %v81_v55 = vld [vmem:[%s3905_s0 + $0x1d0] sm:$0xff]  ;;  %v171_v57 = vmax.f32 %v83_v47, 0.0  ;;  %v80_v58 = vld [vmem:[%s3905_s0 + $0x1c8] sm:$0xff]  ;;  %v176_v59 = vmax.f32 %v88_v49, 0.0  ;;  %v170_v60 = vmax.f32 %v82_v51, 0.0 }
  0x1c   :  { %320 = vmatprep.subr.mxu0 %v118_v14  ;;  %480 = vmatpush1.msra.mxu1 %v183_v32  ;;  %v79_v61 = vld [vmem:[%s3905_s0 + $0x1c0] sm:$0xff]  ;;  %v175_v62 = vmax.f32 %v87_v53, 0.0  ;;  %v169_v63 = vmax.f32 %v81_v55, 0.0  ;;  %v78_v0 = vld [vmem:[%s3905_s0 + $0x1b8] sm:$0xff]  ;;  %v168_v1 = vmax.f32 %v80_v58, 0.0  ;;  %v77_v2 = vld [vmem:[%s3905_s0 + $0x1b0] sm:$0xff] }
  0x1d   :  { %321 = vmatpush1.msra.mxu0 %v117_v18  ;;  %481 = vmatprep.subr.mxu1 %v182_v36  ;;  %v201_v4 = vld [vmem:[%s3906_s1 + $0x10] sm:$0xff]  ;;  %v167_v5 = vmax.f32 %v79_v61, 0.0  ;;  %v76_v6 = vld [vmem:[%s3905_s0 + $0x1a8] sm:$0xff]  ;;  %v166_v8 = vmax.f32 %v78_v0, 0.0  ;;  %v75_v9 = vld [vmem:[%s3905_s0 + $0x1a0] sm:$0xff]  ;;  %v165_v10 = vmax.f32 %v77_v2, 0.0 }
  0x1e   :  { %322 = vmatprep.subr.mxu0 %v116_v22  ;;  %482 = vmatpush1.msra.mxu1 %v181_v40  ;;  %v200_v7 = vld [vmem:[%s3906_s1 + $0x8] sm:$0xff]  ;;  %v74_v11 = vld [vmem:[%s3905_s0 + $0x198] sm:$0xff]  ;;  %v164_v12 = vmax.f32 %v76_v6, 0.0  ;;  %v73_v13 = vld [vmem:[%s3905_s0 + $0x190] sm:$0xff]  ;;  %v163_v15 = vmax.f32 %v75_v9, 0.0  ;;  %s2293_s29 = smov 113  }
  0x1f   :  { %323 = vmatpush1.msra.mxu0 %v115_v26  ;;  %483 = vmatprep.subr.mxu1 %v180_v44  ;;  %v204_v14 = vld [vmem:[%s3906_s1 + $0x28] sm:$0xff]  ;;  %v162_v17 = vmax.f32 %v74_v11, 0.0  ;;  %v71_v18 = vld [vmem:[%s3905_s0 + $0x180] sm:$0xff]  ;;  %v161_v19 = vmax.f32 %v73_v13, 0.0  ;;  %v70_v20 = vld [vmem:[%s3905_s0 + $0x178] sm:$0xff] }
  0x20   :  { %324 = vmatprep.subr.mxu0 %v114_v30  ;;  %484 = vmatpush1.msra.mxu1 %v179_v48  ;;  %v72_v16 = vld [vmem:[%s3905_s0 + $0x188] sm:$0xff]  ;;  %v69_v22 = vld [vmem:[%s3905_s0 + $0x170] sm:$0xff]  ;;  %v207_v23 = vld [vmem:[%s3906_s1 + $0x40] sm:$0xff]  ;;  %v159_v24 = vmax.f32 %v71_v18, 0.0  ;;  %v158_v26 = vmax.f32 %v70_v20, 0.0 }
  0x21   :  { %325 = vmatpush1.msra.mxu0 %v113_v34  ;;  %485 = vmatprep.subr.mxu1 %v178_v52  ;;  %v160_v21 = vmax.f32 %v72_v16, 0.0  ;;  %v68_v25 = vld [vmem:[%s3905_s0 + $0x168] sm:$0xff]  ;;  %v67_v27 = vld [vmem:[%s3905_s0 + $0x160] sm:$0xff]  ;;  %v157_v28 = vmax.f32 %v69_v22, 0.0  ;;  %v66_v29 = vld [vmem:[%s3905_s0 + $0x158] sm:$0xff] }
  0x22   :  { %326 = vmatprep.subr.mxu0 %v112_v38  ;;  %486 = vmatpush1.msra.mxu1 %v177_v56  ;;  %v156_v30 = vmax.f32 %v68_v25, 0.0  ;;  %v65_v31 = vld [vmem:[%s3905_s0 + $0x150] sm:$0xff]  ;;  %v210_v32 = vld [vmem:[%s3906_s1 + $0x58] sm:$0xff]  ;;  %v155_v33 = vmax.f32 %v67_v27, 0.0  ;;  %v64_v34 = vld [vmem:[%s3905_s0 + $0x148] sm:$0xff]  ;;  %v154_v35 = vmax.f32 %v66_v29, 0.0 }
  0x23   :  { %327 = vmatpush1.msra.mxu0 %v111_v42  ;;  %487 = vmatprep.subr.mxu1 %v176_v59  ;;  %v63_v36 = vld [vmem:[%s3905_s0 + $0x140] sm:$0xff]  ;;  %v153_v37 = vmax.f32 %v65_v31, 0.0  ;;  %v62_v38 = vld [vmem:[%s3905_s0 + $0x138] sm:$0xff]  ;;  %v152_v39 = vmax.f32 %v64_v34, 0.0  ;;  %v61_v40 = vld [vmem:[%s3905_s0 + $0x130] sm:$0xff] }
  0x24   :  { %328 = vmatprep.subr.mxu0 %v174_v46  ;;  %488 = vmatpush1.msra.mxu1 %v175_v62  ;;  %v213_v41 = vld [vmem:[%s3906_s1 + $0x70] sm:$0xff]  ;;  %v151_v42 = vmax.f32 %v63_v36, 0.0  ;;  %v60_v43 = vld [vmem:[%s3905_s0 + $0x128] sm:$0xff]  ;;  %v150_v44 = vmax.f32 %v62_v38, 0.0  ;;  %v59_v45 = vld [vmem:[%s3905_s0 + $0x120] sm:$0xff]  ;;  %v149_v46 = vmax.f32 %v61_v40, 0.0 }
  0x25   :  { %329 = vmatpush2.msra.mxu0 %v173_v50  ;;  %2183 = vmatmul.mubr.msk.f32.vlgmr.msra.gmra.mxu1 %vm247_vm0, %v201_v4  ;;  %v58_v47 = vld [vmem:[%s3905_s0 + $0x118] sm:$0xff]  ;;  %v148_v48 = vmax.f32 %v60_v43, 0.0  ;;  %v57_v49 = vld [vmem:[%s3905_s0 + $0x110] sm:$0xff]  ;;  %v216_v50 = vld [vmem:[%s3906_s1 + $0x88] sm:$0xff]  ;;  %v147_v51 = vmax.f32 %v59_v45, 0.0 }
  0x26   :  { %330 = vmatprep.subr.mxu0 %v172_v54  ;;  %360 = vmatprep.mubr.f32.mxu0 %v200_v7  ;;  %v56_v52 = vld [vmem:[%s3905_s0 + $0x108] sm:$0xff]  ;;  %v146_v53 = vmax.f32 %v58_v47, 0.0  ;;  %v55_v54 = vld [vmem:[%s3905_s0 + $0x100] sm:$0xff]  ;;  %v145_v55 = vmax.f32 %v57_v49, 0.0  ;;  %v222_v61 = vld [vmem:[%s3906_s1 + $0xb8] sm:$0xff] }
  0x27   :  { %331 = vmatpush2.msra.mxu0 %v171_v57  ;;  %527 = vmatprep.mubr.f32.mxu1 %v2284_v3  ;;  %v144_v56 = vmax.f32 %v56_v52, 0.0  ;;  %v219_v57 = vld [vmem:[%s3906_s1 + $0xa0] sm:$0xff]  ;;  %v143_v58 = vmax.f32 %v55_v54, 0.0  ;;  %v202_v62 = vld [vmem:[%s3906_s1 + $0x18] sm:$0xff]  ;;  %v225_v0 = vld [vmem:[%s3906_s1 + $0xd0] sm:$0xff] }
  0x28   :  { %332 = vmatprep.subr.mxu0 %v170_v60  ;;  %v199_v59 = vld [vmem:[%s3906_s1] sm:$0xff]  ;;  %v209_v2 = vld [vmem:[%s3906_s1 + $0x50] sm:$0xff]  ;;  %v228_v4 = vld [vmem:[%s3906_s1 + $0xe8] sm:$0xff] }
  0x29   :  { %333 = vmatpush2.msra.mxu0 %v169_v63  ;;  %2184 = vmatmul.mubr.msk.f32.gmra.mxu1 %vm247_vm0, %v204_v14  ;;  %v203_v60 = vld [vmem:[%s3906_s1 + $0x20] sm:$0xff]  ;;  %v206_v63 = vld [vmem:[%s3906_s1 + $0x38] sm:$0xff]  ;;  %v212_v6 = vld [vmem:[%s3906_s1 + $0x68] sm:$0xff] }
  0x2a   :  { %334 = vmatprep.subr.mxu0 %v168_v1  ;;  %533 = vmatprep.mubr.f32.mxu1 %v2284_v3  ;;  %v205_v1 = vld [vmem:[%s3906_s1 + $0x30] sm:$0xff]  ;;  %v231_v7 = vld [vmem:[%s3906_s1 + $0x100] sm:$0xff]  ;;  %v214_v11 = vld [vmem:[%s3906_s1 + $0x78] sm:$0xff] }
  0x2b   :  { %335 = vmatpush2.msra.mxu0 %v167_v5  ;;  %v208_v5 = vld [vmem:[%s3906_s1 + $0x48] sm:$0xff]  ;;  %v215_v9 = vld [vmem:[%s3906_s1 + $0x80] sm:$0xff]  ;;  %v237_v13 = vld [vmem:[%s3906_s1 + $0x130] sm:$0xff] }
  0x2c   :  { %336 = vmatprep.subr.mxu0 %v166_v8  ;;  %v211_v8 = vld [vmem:[%s3906_s1 + $0x60] sm:$0xff]  ;;  %v217_v14 = vld [vmem:[%s3906_s1 + $0x90] sm:$0xff]  ;;  %v240_v16 = vld [vmem:[%s3906_s1 + $0x148] sm:$0xff] }
  0x2d   :  { %337 = vmatpush2.msra.mxu0 %v165_v10  ;;  %2185 = vmatmul.mubr.msk.f32.gmra.mxu1 %vm247_vm0, %v207_v23  ;;  %v234_v10 = vld [vmem:[%s3906_s1 + $0x118] sm:$0xff]  ;;  %v224_v18 = vld [vmem:[%s3906_s1 + $0xc8] sm:$0xff]  ;;  %v223_v20 = vld [vmem:[%s3906_s1 + $0xc0] sm:$0xff] }
  0x2e   :  { %338 = vmatprep.subr.mxu0 %v164_v12  ;;  %539 = vmatprep.mubr.f32.mxu1 %v2284_v3  ;;  %v218_v12 = vld [vmem:[%s3906_s1 + $0x98] sm:$0xff]  ;;  %v229_v25 = vld [vmem:[%s3906_s1 + $0xf0] sm:$0xff]  ;;  %v232_v27 = vld [vmem:[%s3906_s1 + $0x108] sm:$0xff] }
  0x2f   :  { %339 = vmatpush2.msra.mxu0 %v163_v15  ;;  %v221_v15 = vld [vmem:[%s3906_s1 + $0xb0] sm:$0xff]  ;;  %v246_v22 = vld [vmem:[%s3906_s1 + $0x178] sm:$0xff]  ;;  %v235_v29 = vld [vmem:[%s3906_s1 + $0x120] sm:$0xff] }
  0x30   :  { %340 = vmatprep.subr.mxu0 %v162_v17  ;;  %v220_v17 = vld [vmem:[%s3906_s1 + $0xa8] sm:$0xff]  ;;  %v226_v23 = vld [vmem:[%s3906_s1 + $0xd8] sm:$0xff]  ;;  %v245_v34 = vld [vmem:[%s3906_s1 + $0x170] sm:$0xff] }
  0x31   :  { %341 = vmatpush2.msra.mxu0 %v161_v19  ;;  %2186 = vmatmul.mubr.msk.f32.gmra.mxu1 %vm247_vm0, %v210_v32  ;;  %v243_v19 = vld [vmem:[%s3906_s1 + $0x160] sm:$0xff]  ;;  %v238_v31 = vld [vmem:[%s3906_s1 + $0x138] sm:$0xff] }
  0x32   :  { %342 = vmatprep.subr.mxu0 %v160_v21  ;;  %545 = vmatprep.mubr.f32.mxu1 %v2284_v3  ;;  %v227_v21 = vld [vmem:[%s3906_s1 + $0xe0] sm:$0xff]  ;;  %v242_v32 = vld [vmem:[%s3906_s1 + $0x158] sm:$0xff] }
  0x33   :  { %343 = vmatpush2.msra.mxu0 %v159_v24  ;;  %v230_v24 = vld [vmem:[%s3906_s1 + $0xf8] sm:$0xff] }
  0x34   :  { %344 = vmatprep.subr.mxu0 %v158_v26  ;;  %v233_v26 = vld [vmem:[%s3906_s1 + $0x110] sm:$0xff] }
  0x35   :  { %345 = vmatpush2.msra.mxu0 %v157_v28  ;;  %2187 = vmatmul.mubr.msk.f32.gmra.mxu1 %vm247_vm0, %v213_v41  ;;  %v236_v28 = vld [vmem:[%s3906_s1 + $0x128] sm:$0xff] }
  0x36   :  { %346 = vmatprep.subr.mxu0 %v156_v30  ;;  %551 = vmatprep.mubr.f32.mxu1 %v2284_v3  ;;  %v239_v30 = vld [vmem:[%s3906_s1 + $0x140] sm:$0xff] }
  0x37   :  { %347 = vmatpush2.msra.mxu0 %v155_v33  ;;  %v241_v33 = vld [vmem:[%s3906_s1 + $0x150] sm:$0xff] }
  0x38   :  { %348 = vmatprep.subr.mxu0 %v154_v35  ;;  %v244_v35 = vld [vmem:[%s3906_s1 + $0x168] sm:$0xff]  ;;  %s2287_s1 = smov 15  }
  0x39   :  { %349 = vmatpush2.msra.mxu0 %v153_v37  ;;  %2188 = vmatmul.mubr.msk.f32.gmra.mxu1 %vm247_vm0, %v216_v50 }
  0x3a   :  { %350 = vmatprep.subr.mxu0 %v152_v39  ;;  %557 = vmatprep.mubr.f32.mxu1 %v2284_v3 }
  0x3b   :  { %351 = vmatpush2.msra.mxu0 %v151_v42 }
  0x3c   :  { %352 = vmatprep.subr.mxu0 %v150_v44 }
  0x3d   :  { %353 = vmatpush2.msra.mxu0 %v149_v46  ;;  %2189 = vmatmul.mubr.msk.f32.gmra.mxu1 %vm247_vm0, %v219_v57 }
  0x3e   :  { %354 = vmatprep.subr.mxu0 %v148_v48  ;;  %563 = vmatprep.mubr.f32.mxu1 %v2284_v3 }
  0x3f   :  { %355 = vmatpush2.msra.mxu0 %v147_v51 }
  0x40   :  { %356 = vmatprep.subr.mxu0 %v146_v53 }
  0x41   :  { %357 = vmatpush2.msra.mxu0 %v145_v55  ;;  %2190 = vmatmul.mubr.msk.f32.gmra.mxu1 %vm247_vm0, %v222_v61 }
  0x42   :  { %358 = vmatprep.subr.mxu0 %v144_v56  ;;  %569 = vmatprep.mubr.f32.mxu1 %v2284_v3 }
  0x43   :  { %359 = vmatpush2.msra.mxu0 %v143_v58 }
  0x44   :  { %361 = vmatmul.mubr.f32.vlgmr.msra.gmra.mxu0 %v199_v59 }
  0x45   :  { %366 = vmatprep.mubr.f32.mxu0 %v203_v60  ;;  %2191 = vmatmul.mubr.msk.f32.gmra.mxu1 %vm247_vm0, %v225_v0 }
  0x46   :  { %575 = vmatprep.mubr.f32.mxu1 %v2284_v3 }
  0x48   :  { %367 = vmatmul.mubr.f32.gmra.mxu0 %v202_v62 }
  0x49   :  { %372 = vmatprep.mubr.f32.mxu0 %v206_v63  ;;  %2192 = vmatmul.mubr.msk.f32.gmra.mxu1 %vm247_vm0, %v228_v4 }
  0x4a   :  { %581 = vmatprep.mubr.f32.mxu1 %v2284_v3 }
  0x4c   :  { %373 = vmatmul.mubr.f32.gmra.mxu0 %v205_v1 }
  0x4d   :  { %378 = vmatprep.mubr.f32.mxu0 %v209_v2  ;;  %2193 = vmatmul.mubr.msk.f32.gmra.mxu1 %vm247_vm0, %v231_v7 }
  0x4e   :  { %587 = vmatprep.mubr.f32.mxu1 %v2284_v3 }
  0x50   :  { %379 = vmatmul.mubr.f32.gmra.mxu0 %v208_v5 }
  0x51   :  { %384 = vmatprep.mubr.f32.mxu0 %v212_v6  ;;  %2194 = vmatmul.mubr.msk.f32.gmra.mxu1 %vm247_vm0, %v234_v10 }
  0x52   :  { %593 = vmatprep.mubr.f32.mxu1 %v2284_v3 }
  0x54   :  { %385 = vmatmul.mubr.f32.gmra.mxu0 %v211_v8 }
  0x55   :  { %390 = vmatprep.mubr.f32.mxu0 %v215_v9  ;;  %2195 = vmatmul.mubr.msk.f32.gmra.mxu1 %vm247_vm0, %v237_v13 }
  0x56   :  { %599 = vmatprep.mubr.f32.mxu1 %v2284_v3 }
  0x58   :  { %391 = vmatmul.mubr.f32.gmra.mxu0 %v214_v11 }
  0x59   :  { %396 = vmatprep.mubr.f32.mxu0 %v218_v12  ;;  %2196 = vmatmul.mubr.msk.f32.gmra.mxu1 %vm247_vm0, %v240_v16 }
  0x5a   :  { %605 = vmatprep.mubr.f32.mxu1 %v2284_v3 }
  0x5c   :  { %397 = vmatmul.mubr.f32.gmra.mxu0 %v217_v14 }
  0x5d   :  { %402 = vmatprep.mubr.f32.mxu0 %v221_v15  ;;  %2197 = vmatmul.mubr.msk.f32.gmra.mxu1 %vm247_vm0, %v243_v19 }
  0x5e   :  { %611 = vmatprep.mubr.f32.mxu1 %v2284_v3 }
  0x60   :  { %403 = vmatmul.mubr.f32.gmra.mxu0 %v220_v17 }
  0x61   :  { %408 = vmatprep.mubr.f32.mxu0 %v224_v18  ;;  %2198 = vmatmul.mubr.msk.f32.gmra.mxu1 %vm247_vm0, %v246_v22 }
  0x62   :  { %1390 = vmatprep.mubr.f32.mxu1 %v2284_v3 }
  0x64   :  { %409 = vmatmul.mubr.f32.gmra.mxu0 %v223_v20 }
  0x65   :  { %414 = vmatprep.mubr.f32.mxu0 %v227_v21 }
  0x68   :  { %415 = vmatmul.mubr.f32.gmra.mxu0 %v226_v23 }
  0x69   :  { %420 = vmatprep.mubr.f32.mxu0 %v230_v24 }
  0x6c   :  { %421 = vmatmul.mubr.f32.gmra.mxu0 %v229_v25 }
  0x6d   :  { %426 = vmatprep.mubr.f32.mxu0 %v233_v26 }
  0x70   :  { %427 = vmatmul.mubr.f32.gmra.mxu0 %v232_v27 }
  0x71   :  { %432 = vmatprep.mubr.f32.mxu0 %v236_v28 }
  0x74   :  { %433 = vmatmul.mubr.f32.gmra.mxu0 %v235_v29 }
  0x75   :  { %438 = vmatprep.mubr.f32.mxu0 %v239_v30 }
  0x78   :  { %439 = vmatmul.mubr.f32.gmra.mxu0 %v238_v31 }
  0x79   :  { %444 = vmatprep.mubr.f32.mxu0 %v242_v32 }
  0x7c   :  { %445 = vmatmul.mubr.f32.gmra.mxu0 %v241_v33 }
  0x7d   :  { %450 = vmatprep.mubr.f32.mxu0 %v245_v34 }
  0x80   :  { %451 = vmatmul.mubr.f32.gmra.mxu0 %v244_v35 }
  0x81   :  { %1312 = vmatprep.mubr.f32.mxu0 %v2284_v3 }
  0xe5   :  { %v523_v36 = vpop.f32.mrf.mxu1 }
  0xe7   :  { %v525_v37 = vpop.f32.mrf.mxu1 }
  0xe9   :  { %v529_v38 = vpop.f32.mrf.mxu1 }
  0xeb   :  { %v531_v39 = vpop.f32.mrf.mxu1 }
  0xed   :  { %v535_v40 = vpop.f32.mrf.mxu1 }
  0xef   :  { %v537_v41 = vpop.f32.mrf.mxu1 }
  0xf1   :  { %v541_v42 = vpop.f32.mrf.mxu1 }
  0xf3   :  { %v543_v43 = vpop.f32.mrf.mxu1 }
  0xf5   :  { %v2807_v44 = vpop.f32.mrf.mxu1 }
  0xf7   :  { %v2809_v45 = vpop.f32.mrf.mxu1 }
  0xf9   :  { %v2811_v46 = vpop.f32.mrf.mxu1 }
  0xfb   :  { %v2813_v47 = vpop.f32.mrf.mxu1 }
  0xfd   :  { %v2815_v48 = vpop.f32.mrf.mxu1 }
  0xff   :  { %v2817_v49 = vpop.f32.mrf.mxu1 }
 0x101   :  { %v2821_v51 = vpop.f32.mrf.mxu1 }
 0x103   :  { %v2825_v54 = vpop.f32.mrf.mxu1 }
 0x104   :  { %v362_v3 = vpop.f32.mrf.mxu0 }
 0x105   :  { %v2819_v50 = vadd.f32 %v523_v36, %v362_v3  ;;  %v2829_v57 = vpop.f32.mrf.mxu1 }
 0x106   :  { %v364_v52 = vpop.f32.mrf.mxu0 }
 0x107   :  { %3919 = vst [vmem:[#allocation3_spill] sm:$0xff] %v2819_v50  ;;  %v2823_v53 = vadd.f32 %v525_v37, %v364_v52  ;;  %v573_v60 = vpop.f32.mrf.mxu1 }
 0x108   :  { %v368_v55 = vpop.f32.mrf.mxu0 }
 0x109   :  { %3920 = vst [vmem:[#allocation4_spill] sm:$0xff] %v2823_v53  ;;  %v2827_v56 = vadd.f32 %v529_v38, %v368_v55  ;;  %v2835_v0 = vpop.f32.mrf.mxu1 }
 0x10a   :  { %v370_v58 = vpop.f32.mrf.mxu0 }
 0x10b   :  { %v2831_v59 = vadd.f32 %v531_v39, %v370_v58  ;;  %v2841_v6 = vpop.f32.mrf.mxu1 }
 0x10c   :  { %v374_v61 = vpop.f32.mrf.mxu0 }
 0x10d   :  { %3921 = vst [vmem:[#allocation5_spill] sm:$0xff] %v2831_v59  ;;  %v2833_v62 = vadd.f32 %v535_v40, %v374_v61  ;;  %v583_v10 = vpop.f32.mrf.mxu1 }
 0x10e   :  { %v376_v63 = vpop.f32.mrf.mxu0 }
 0x10f   :  { %v2837_v1 = vadd.f32 %v537_v41, %v376_v63  ;;  %v585_v13 = vpop.f32.mrf.mxu1 }
 0x110   :  { %v380_v2 = vpop.f32.mrf.mxu0 }
 0x111   :  { %v2839_v4 = vadd.f32 %v541_v42, %v380_v2  ;;  %v2855_v16 = vpop.f32.mrf.mxu1 }
 0x112   :  { %v382_v5 = vpop.f32.mrf.mxu0 }
 0x113   :  { %v2843_v7 = vadd.f32 %v543_v43, %v382_v5  ;;  %v591_v19 = vpop.f32.mrf.mxu1 }
 0x114   :  { %v2845_v8 = vpop.f32.mrf.mxu0 }
 0x115   :  { %v595_v22 = vpop.f32.mrf.mxu1 }
 0x116   :  { %v2847_v9 = vpop.f32.mrf.mxu0 }
 0x117   :  { %v597_v25 = vpop.f32.mrf.mxu1 }
 0x118   :  { %v2849_v11 = vpop.f32.mrf.mxu0 }
 0x119   :  { %v601_v28 = vpop.f32.mrf.mxu1 }
 0x11a   :  { %v2851_v12 = vpop.f32.mrf.mxu0 }
 0x11b   :  { %v603_v31 = vpop.f32.mrf.mxu1 }
 0x11c   :  { %v2853_v14 = vpop.f32.mrf.mxu0 }
 0x11d   :  { %v607_v34 = vpop.f32.mrf.mxu1 }
 0x11e   :  { %v400_v15 = vpop.f32.mrf.mxu0 }
 0x11f   :  { %v609_v37 = vpop.f32.mrf.mxu1 }
 0x120   :  { %v2857_v17 = vpop.f32.mrf.mxu0 }
 0x121   :  { %v613_v3 = vpop.f32.mrf.mxu1 }
 0x122   :  { %v2859_v18 = vpop.f32.mrf.mxu0 }
 0x123   :  { %v615_v2 = vpop.f32.mrf.mxu1 }
 0x124   :  { %v410_v20 = vpop.f32.mrf.mxu0 }
 0x126   :  { %v412_v21 = vpop.f32.mrf.mxu0 }
 0x128   :  { %v2861_v23 = vpop.f32.mrf.mxu0 }
 0x12a   :  { %v418_v24 = vpop.f32.mrf.mxu0 }
 0x12c   :  { %v422_v26 = vpop.f32.mrf.mxu0 }
 0x12e   :  { %v424_v27 = vpop.f32.mrf.mxu0 }
 0x12f   :  { %v2872_v55 = vadd.f32 %v585_v13, %v424_v27  ;;  %v2887_v27 = vadd.f32 %v583_v10, %v422_v26  ;;  %v2905_v26 = vadd.f32 %v2829_v57, %v410_v20  ;;  %v2924_v20 = vadd.f32 %v2815_v48, %v2853_v14 }
 0x130   :  { %v428_v29 = vpop.f32.mrf.mxu0  ;;  %v2941_v14 = vadd.f32 %v2807_v44, %v2845_v8 }
 0x131   :  { %v659_v13 = vsel %vm618_vm1, %v2872_v55, 0.0  ;;  %3923 = vst [vmem:[#allocation7_spill] sm:$0xff] %v2924_v20 }
 0x132   :  { %v430_v30 = vpop.f32.mrf.mxu0  ;;  %3924 = vst [vmem:[#allocation8_spill] sm:$0xff] %v2941_v14 }
 0x134   :  { %v434_v32 = vpop.f32.mrf.mxu0 }
 0x135   :  { %v2876_v61 = vadd.f32 %v595_v22, %v434_v32  ;;  %v660_v32 = vadd.f32 %v659_v13, %v2887_v27 }
 0x136   :  { %v436_v33 = vpop.f32.mrf.mxu0 }
 0x137   :  { %v2863_v38 = vadd.f32 %v597_v25, %v436_v33 }
 0x138   :  { %v440_v35 = vpop.f32.mrf.mxu0 }
 0x139   :  { %v2867_v40 = vadd.f32 %v601_v28, %v440_v35  ;;  %v667_v58 = vsel %vm618_vm1, %v2863_v38, 0.0  ;;  %v2879_v28 = vadd.f32 %v573_v60, %v412_v21  ;;  %v2896_v21 = vadd.f32 %v2817_v49, %v400_v15 }
 0x13a   :  { %v442_v36 = vpop.f32.mrf.mxu0  ;;  %v668_v25 = vadd.f32 %v667_v58, %v2876_v61  ;;  %v2913_v15 = vadd.f32 %v2809_v45, %v2847_v9  ;;  %v2933_v9 = vadd.f32 %v2825_v54, %v2859_v18  ;;  %v2951_v18 = vadd.f32 %v2813_v47, %v2851_v12 }
 0x13b   :  { %v2865_v39 = vadd.f32 %v603_v31, %v442_v36  ;;  %v2898_v36 = vadd.f32 %v591_v19, %v430_v30  ;;  %v2916_v19 = vadd.f32 %v2841_v6, %v418_v24  ;;  %v643_v30 = vsel %vm618_vm1, %v2896_v21, 0.0 }
 0x13c   :  { %v446_v41 = vpop.f32.mrf.mxu0  ;;  %3922 = vst [vmem:[#allocation6_spill] sm:$0xff] %v2913_v15  ;;  %v644_v45 = vadd.f32 %v643_v30, %v2924_v20  ;;  %v635_v24 = vsel %vm618_vm1, %v2913_v15, 0.0  ;;  %v647_v44 = vsel %vm618_vm1, %v2933_v9, 0.0  ;;  %v619_v47 = vsel %vm618_vm1, %v2823_v53, 0.0 }
 0x13d   :  { %v671_v42 = vsel %vm618_vm1, %v2865_v39, 0.0  ;;  %v663_v57 = vsel %vm618_vm1, %v2898_v36, 0.0  ;;  %v655_v48 = vsel %vm618_vm1, %v2916_v19, 0.0  ;;  %v639_v12 = vsel %vm618_vm1, %v2951_v18, 0.0 }
 0x13e   :  { %v448_v43 = vpop.f32.mrf.mxu0  ;;  %v672_v52 = vadd.f32 %v671_v42, %v2867_v40  ;;  %v2907_v42 = vadd.f32 %v607_v34, %v446_v41  ;;  %v2927_v34 = vadd.f32 %v2855_v16, %v428_v29  ;;  %v2945_v16 = vadd.f32 %v2835_v0, %v2861_v23 }
 0x13f   :  { %v2881_v31 = vadd.f32 %v609_v37, %v448_v43  ;;  %v651_v37 = vsel %vm618_vm1, %v2879_v28, 0.0  ;;  %v636_v29 = vadd.f32 %v635_v24, %v2941_v14  ;;  %v627_v41 = vsel %vm618_vm1, %v2837_v1, 0.0 }
 0x140   :  { %673 = vadd.xlane.f32.xlu1 %v672_v52  ;;  %v452_v63 = vpop.f32.mrf.mxu0  ;;  %v652_v43 = vadd.f32 %v651_v37, %v2905_v26  ;;  %v664_v6 = vadd.f32 %v663_v57, %v2927_v34  ;;  %v656_v54 = vadd.f32 %v655_v48, %v2945_v16  ;;  %v2959_v0 = vadd.f32 %v2821_v51, %v2857_v17 }
 0x141   :  { %v2889_v35 = vadd.f32 %v613_v3, %v452_v63  ;;  %v675_v10 = vsel %vm618_vm1, %v2881_v31, 0.0  ;;  %v628_v8 = vadd.f32 %v627_v41, %v2833_v62  ;;  %v2969_v3 = vadd.f32 %v2811_v46, %v2849_v11 }
 0x142   :  { %v454_v5 = vpop.f32.mrf.mxu0  ;;  %v676_v49 = vadd.f32 %v675_v10, %v2907_v42  ;;  %v648_v23 = vadd.f32 %v647_v44, %v2959_v0  ;;  %v620_v51 = vadd.f32 %v619_v47, %v2819_v50  ;;  %v631_v52 = vsel %vm618_vm1, %v2843_v7, 0.0 }
 0x143   :  { %v2883_v33 = vadd.f32 %v615_v2, %v454_v5  ;;  %3925 = vst [vmem:[#allocation9_spill] sm:$0xff] %v2969_v3  ;;  %v640_v17 = vadd.f32 %v639_v12, %v2969_v3  ;;  %v632_v58 = vadd.f32 %v631_v52, %v2839_v4  ;;  %v623_v63 = vsel %vm618_vm1, %v2831_v59, 0.0 }
 0x144   :  { %669 = vadd.xlane.f32.xlu1 %v668_v25  ;;  %v624_v46 = vadd.f32 %v623_v63, %v2827_v56 }
 0x145   :  { %v679_v22 = vsel %vm618_vm1, %v2883_v33, 0.0 }
 0x146   :  { %v680_v60 = vadd.f32 %v679_v22, %v2889_v35 }
 0x148   :  { %661 = vadd.xlane.f32.xlu1 %v660_v32  ;;  %681 = vadd.xlane.f32.xlu0 %v680_v60 }
 0x14c   :  { %653 = vadd.xlane.f32.xlu1 %v652_v43  ;;  %677 = vadd.xlane.f32.xlu0 %v676_v49 }
 0x150   :  { %645 = vadd.xlane.f32.xlu1 %v644_v45  ;;  %665 = vadd.xlane.f32.xlu0 %v664_v6 }
 0x154   :  { %637 = vadd.xlane.f32.xlu1 %v636_v29  ;;  %657 = vadd.xlane.f32.xlu0 %v656_v54 }
 0x158   :  { %629 = vadd.xlane.f32.xlu1 %v628_v8  ;;  %649 = vadd.xlane.f32.xlu0 %v648_v23 }
 0x15c   :  { %621 = vadd.xlane.f32.xlu1 %v620_v51  ;;  %641 = vadd.xlane.f32.xlu0 %v640_v17 }
 0x160   :  { %633 = vadd.xlane.f32.xlu0 %v632_v58 }
 0x164   :  { %625 = vadd.xlane.f32.xlu0 %v624_v46 }
 0x1c9   :  { %v674_v11 = vpop.xlane.xlu1 %673 }
 0x1ca   :  { %v2979_v2 = vmul.f32 0.0051020407, %v674_v11 }
 0x1cc   :  { %v727_v32 = vsub.f32 %v2865_v39, %v2979_v2  ;;  %v726_v49 = vsub.f32 %v2867_v40, %v2979_v2 }
 0x1cd   :  { %v670_v5 = vpop.xlane.xlu1 %669 }
 0x1ce   :  { %v2981_v25 = vmul.f32 0.0051020407, %v670_v5  ;;  %v759_v45 = vmul.f32 %v727_v32, %v727_v32  ;;  %v758_v44 = vmul.f32 %v726_v49, %v726_v49 }
 0x1d0   :  { %v725_v6 = vsub.f32 %v2863_v38, %v2981_v25  ;;  %v816_v17 = vsel %vm618_vm1, %v759_v45, 0.0  ;;  %v724_v52 = vsub.f32 %v2876_v61, %v2981_v25 }
 0x1d1   :  { %v662_v13 = vpop.xlane.xlu1 %661  ;;  %v682_v22 = vpop.xlane.xlu0 %681  ;;  %v817_v45 = vadd.f32 %v816_v17, %v758_v44 }
 0x1d2   :  { %v2985_v60 = vmul.f32 0.0051020407, %v682_v22  ;;  %v2987_v37 = vmul.f32 0.0051020407, %v662_v13  ;;  %v757_v58 = vmul.f32 %v725_v6, %v725_v6 }
 0x1d4   :  { %v730_v10 = vsub.f32 %v2889_v35, %v2985_v60  ;;  %v731_v43 = vsub.f32 %v2883_v33, %v2985_v60  ;;  %v721_v54 = vsub.f32 %v2872_v55, %v2987_v37  ;;  %v720_v13 = vsub.f32 %v2887_v27, %v2987_v37 }
 0x1d5   :  { %v654_v30 = vpop.xlane.xlu1 %653  ;;  %v678_v57 = vpop.xlane.xlu0 %677 }
 0x1d6   :  { %v2997_v24 = vmul.f32 0.0051020407, %v678_v57  ;;  %v762_v48 = vmul.f32 %v730_v10, %v730_v10  ;;  %v763_v29 = vmul.f32 %v731_v43, %v731_v43  ;;  %v3009_v63 = vmul.f32 0.0051020407, %v654_v30 }
 0x1d7   :  { %v753_v22 = vmul.f32 %v721_v54, %v721_v54 }
 0x1d8   :  { %v824_v41 = vsel %vm618_vm1, %v763_v29, 0.0  ;;  %v728_v8 = vsub.f32 %v2907_v42, %v2997_v24  ;;  %v729_v23 = vsub.f32 %v2881_v31, %v2997_v24  ;;  %v812_v29 = vsel %vm618_vm1, %v757_v58, 0.0 }
 0x1d9   :  { %v646_v47 = vpop.xlane.xlu1 %645  ;;  %v666_v12 = vpop.xlane.xlu0 %665  ;;  %v825_v51 = vadd.f32 %v824_v41, %v762_v48  ;;  %v756_v48 = vmul.f32 %v724_v52, %v724_v52 }
 0x1da   :  { %v3011_v46 = vmul.f32 0.0051020407, %v666_v12  ;;  %v760_v11 = vmul.f32 %v728_v8, %v728_v8  ;;  %v761_v5 = vmul.f32 %v729_v23, %v729_v23  ;;  %v3015_v32 = vmul.f32 0.0051020407, %v646_v47 }
 0x1db   :  { %826 = vadd.xlane.f32.xlu0 %v825_v51  ;;  %v717_v23 = vsub.f32 %v2879_v28, %v3009_v63  ;;  %v752_v47 = vmul.f32 %v720_v13, %v720_v13  ;;  %v804_v12 = vsel %vm618_vm1, %v753_v22, 0.0  ;;  %v716_v13 = vsub.f32 %v2905_v26, %v3009_v63 }
 0x1dc   :  { %v820_v10 = vsel %vm618_vm1, %v761_v5, 0.0  ;;  %v722_v43 = vsub.f32 %v2927_v34, %v3011_v46  ;;  %v723_v49 = vsub.f32 %v2898_v36, %v3011_v46  ;;  %v713_v52 = vsub.f32 %v2896_v21, %v3015_v32 }
 0x1dd   :  { %v638_v30 = vpop.xlane.xlu1 %637  ;;  %v658_v57 = vpop.xlane.xlu0 %657  ;;  %v821_v6 = vadd.f32 %v820_v10, %v760_v11  ;;  %v813_v10 = vadd.f32 %v812_v29, %v756_v48 }
 0x1de   :  { %v3023_v41 = vmul.f32 0.0051020407, %v658_v57  ;;  %v754_v54 = vmul.f32 %v722_v43, %v722_v43  ;;  %v755_v8 = vmul.f32 %v723_v49, %v723_v49  ;;  %v3035_v58 = vmul.f32 0.0051020407, %v638_v30 }
 0x1df   :  { %818 = vadd.xlane.f32.xlu0 %v817_v45  ;;  %822 = vadd.xlane.f32.xlu1 %v821_v6  ;;  %v749_v45 = vmul.f32 %v717_v23, %v717_v23  ;;  %v805_v6 = vadd.f32 %v804_v12, %v752_v47  ;;  %v748_v23 = vmul.f32 %v716_v13, %v716_v13 }
 0x1e0   :  { %v808_v51 = vsel %vm618_vm1, %v755_v8, 0.0  ;;  %v718_v44 = vsub.f32 %v2945_v16, %v3023_v41  ;;  %v719_v17 = vsub.f32 %v2916_v19, %v3023_v41  ;;  %v712_v8 = vsub.f32 %v2924_v20, %v3015_v32 }
 0x1e1   :  { %v630_v11 = vpop.xlane.xlu1 %629  ;;  %v650_v5 = vpop.xlane.xlu0 %649  ;;  %v809_v43 = vadd.f32 %v808_v51, %v754_v54  ;;  %v745_v54 = vmul.f32 %v713_v52, %v713_v52  ;;  %v709_v47 = vsub.f32 %v2913_v15, %v3035_v58  ;;  %v708_v52 = vsub.f32 %v2941_v14, %v3035_v58 }
 0x1e2   :  { %v3039_v22 = vmul.f32 0.0051020407, %v650_v5  ;;  %v750_v49 = vmul.f32 %v718_v44, %v718_v44  ;;  %v751_v57 = vmul.f32 %v719_v17, %v719_v17  ;;  %v3048_v51 = vmul.f32 0.0051020407, %v630_v11 }
 0x1e3   :  { %814 = vadd.xlane.f32.xlu1 %v813_v10  ;;  %810 = vadd.xlane.f32.xlu0 %v809_v43  ;;  %v796_v5 = vsel %vm618_vm1, %v749_v45, 0.0  ;;  %v744_v20 = vmul.f32 %v712_v8, %v712_v8  ;;  %v788_v13 = vsel %vm618_vm1, %v745_v54, 0.0 }
 0x1e4   :  { %v800_v30 = vsel %vm618_vm1, %v751_v57, 0.0  ;;  %v714_v48 = vsub.f32 %v2959_v0, %v3039_v22  ;;  %v715_v29 = vsub.f32 %v2933_v9, %v3039_v22 }
 0x1e5   :  { %v642_v44 = vpop.xlane.xlu0 %641  ;;  %v801_v17 = vadd.f32 %v800_v30, %v750_v49  ;;  %v622_v57 = vpop.xlane.xlu1 %621  ;;  %v789_v54 = vadd.f32 %v788_v13, %v744_v20 }
 0x1e6   :  { %v3052_v12 = vmul.f32 0.0051020407, %v642_v44  ;;  %v746_v10 = vmul.f32 %v714_v48, %v714_v48  ;;  %v747_v43 = vmul.f32 %v715_v29, %v715_v29  ;;  %v797_v48 = vadd.f32 %v796_v5, %v748_v23 }
 0x1e7   :  { %806 = vadd.xlane.f32.xlu1 %v805_v6  ;;  %802 = vadd.xlane.f32.xlu0 %v801_v17  ;;  %v741_v44 = vmul.f32 %v709_v47, %v709_v47  ;;  %v705_v6 = vsub.f32 %v2837_v1, %v3048_v51  ;;  %v3065_v8 = vmul.f32 0.0051020407, %v622_v57 }
 0x1e8   :  { %v792_v11 = vsel %vm618_vm1, %v747_v43, 0.0  ;;  %v710_v49 = vsub.f32 %v2969_v3, %v3052_v12  ;;  %v711_v30 = vsub.f32 %v2951_v18, %v3052_v12  ;;  %v740_v3 = vmul.f32 %v708_v52, %v708_v52 }
 0x1e9   :  { %v634_v45 = vpop.xlane.xlu0 %633  ;;  %v793_v29 = vadd.f32 %v792_v11, %v746_v10  ;;  %v780_v57 = vsel %vm618_vm1, %v741_v44, 0.0  ;;  %v704_v11 = vsub.f32 %v2833_v62, %v3048_v51 }
 0x1ea   :  { %v3067_v17 = vmul.f32 0.0051020407, %v634_v45  ;;  %v742_v43 = vmul.f32 %v710_v49, %v710_v49  ;;  %v743_v14 = vmul.f32 %v711_v30, %v711_v30  ;;  %v737_v49 = vmul.f32 %v705_v6, %v705_v6 }
 0x1eb   :  { %798 = vadd.xlane.f32.xlu1 %v797_v48  ;;  %794 = vadd.xlane.f32.xlu0 %v793_v29  ;;  %v781_v48 = vadd.f32 %v780_v57, %v740_v3  ;;  %v736_v44 = vmul.f32 %v704_v11, %v704_v11  ;;  %v700_v6 = vsub.f32 %v2819_v50, %v3065_v8  ;;  %v2285_v57 = vmov 0  }
 0x1ec   :  { %v784_v15 = vsel %vm618_vm1, %v743_v14, 0.0  ;;  %v706_v23 = vsub.f32 %v2839_v4, %v3067_v17  ;;  %v707_v47 = vsub.f32 %v2843_v7, %v3067_v17  ;;  %v701_v14 = vsub.f32 %v2823_v53, %v3065_v8  ;;  %2249 = vset.pattern.permute.xlu0 %v2285_v57  ;;  %2250 = vset.pattern.permute.xlu1 %v2285_v57 }
 0x1ed   :  { %v626_v5 = vpop.xlane.xlu0 %625  ;;  %v785_v10 = vadd.f32 %v784_v15, %v742_v43  ;;  %v772_v43 = vsel %vm618_vm1, %v737_v49, 0.0  ;;  %v732_v53 = vmul.f32 %v700_v6, %v700_v6 }
 0x1ee   :  { %v3077_v30 = vmul.f32 0.0051020407, %v626_v5  ;;  %v738_v20 = vmul.f32 %v706_v23, %v706_v23  ;;  %v739_v13 = vmul.f32 %v707_v47, %v707_v47 }
 0x1ef   :  { %790 = vadd.xlane.f32.xlu1 %v789_v54  ;;  %786 = vadd.xlane.f32.xlu0 %v785_v10  ;;  %v733_v54 = vmul.f32 %v701_v14, %v701_v14  ;;  %v773_v10 = vadd.f32 %v772_v43, %v736_v44 }
 0x1f0   :  { %v776_v52 = vsel %vm618_vm1, %v739_v13, 0.0  ;;  %v702_v15 = vsub.f32 %v2827_v56, %v3077_v30  ;;  %v703_v45 = vsub.f32 %v2831_v59, %v3077_v30 }
 0x1f1   :  { %v777_v29 = vadd.f32 %v776_v52, %v738_v20  ;;  %v764_v59 = vsel %vm618_vm1, %v733_v54, 0.0 }
 0x1f2   :  { %v734_v23 = vmul.f32 %v702_v15, %v702_v15  ;;  %v735_v47 = vmul.f32 %v703_v45, %v703_v45  ;;  %v765_v3 = vadd.f32 %v764_v59, %v732_v53 }
 0x1f3   :  { %782 = vadd.xlane.f32.xlu1 %v781_v48  ;;  %778 = vadd.xlane.f32.xlu0 %v777_v29 }
 0x1f4   :  { %v768_v5 = vsel %vm618_vm1, %v735_v47, 0.0 }
 0x1f5   :  { %v769_v13 = vadd.f32 %v768_v5, %v734_v23 }
 0x1f7   :  { %774 = vadd.xlane.f32.xlu1 %v773_v10  ;;  %770 = vadd.xlane.f32.xlu0 %v769_v13 }
 0x1fb   :  { %766 = vadd.xlane.f32.xlu1 %v765_v3 }
 0x264   :  { %v827_v11 = vpop.xlane.xlu0 %826 }
 0x265   :  { %v843_v13 = vmul.f32 0.0051020407, %v827_v11 }
 0x268   :  { %v3091_v49 = vpop.xlane.xlu1 %822  ;;  %v819_v20 = vpop.xlane.xlu0 %818 }
 0x26c   :  { %v815_v14 = vpop.xlane.xlu1 %814  ;;  %v811_v52 = vpop.xlane.xlu0 %810 }
 0x26d   :  { %v839_v54 = vmul.f32 0.0051020407, %v811_v52  ;;  %v840_v57 = vmul.f32 0.0051020407, %v815_v14  ;;  %v851_v52 = vld [vmem:[%s3907_s2 + $0x38] sm:$0xff] }
 0x26f   :  { %v871_v10 = vadd.f32 1e-05, %v839_v54  ;;  %v872_v14 = vadd.f32 1e-05, %v840_v57  ;;  %v916_v54 = vld [vmem:[%s3908_s3 + $0x40] sm:$0xff] }
 0x270   :  { %v807_v15 = vpop.xlane.xlu1 %806  ;;  %v803_v45 = vpop.xlane.xlu0 %802 }
 0x271   :  { %v837_v48 = vmul.f32 0.0051020407, %v803_v45  ;;  %v838_v47 = vmul.f32 0.0051020407, %v807_v15  ;;  %v852_v15 = vld [vmem:[%s3907_s2 + $0x40] sm:$0xff] }
 0x273   :  { %v869_v29 = vadd.f32 1e-05, %v837_v48  ;;  %v870_v5 = vadd.f32 1e-05, %v838_v47  ;;  %v875_v48 = vadd.f32 1e-05, %v843_v13 }
 0x274   :  { %v799_v44 = vpop.xlane.xlu1 %798  ;;  %v795_v6 = vpop.xlane.xlu0 %794  ;;  %v841_v13 = vmul.f32 0.0051020407, %v819_v20 }
 0x275   :  { %v836_v43 = vmul.f32 0.0051020407, %v799_v44  ;;  %v835_v23 = vmul.f32 0.0051020407, %v795_v6  ;;  %2251 = vrsqrt.f32 %v869_v29  ;;  %v853_v29 = vld [vmem:[%s3907_s2 + $0x48] sm:$0xff] }
 0x276   :  { %v873_v20 = vadd.f32 1e-05, %v841_v13 }
 0x277   :  { %v868_v53 = vadd.f32 1e-05, %v836_v43  ;;  %v867_v59 = vadd.f32 1e-05, %v835_v23 }
 0x278   :  { %v791_v3 = vpop.xlane.xlu1 %790  ;;  %v787_v44 = vpop.xlane.xlu0 %786 }
 0x279   :  { %2253 = vrsqrt.f32 %v868_v53  ;;  %v834_v50 = vmul.f32 0.0051020407, %v791_v3  ;;  %v833_v53 = vmul.f32 0.0051020407, %v787_v44 }
 0x27a   :  { %2255 = vrsqrt.f32 %v867_v59 }
 0x27b   :  { %2257 = vrsqrt.f32 %v870_v5  ;;  %v866_v47 = vadd.f32 1e-05, %v834_v50  ;;  %v865_v50 = vadd.f32 1e-05, %v833_v53  ;;  %v842_v53 = vmul.f32 0.0051020407, %v3091_v49 }
 0x27c   :  { %2259 = vrsqrt.f32 %v871_v10  ;;  %v783_v5 = vpop.xlane.xlu1 %782 }
 0x27d   :  { %2261 = vrsqrt.f32 %v875_v48  ;;  %v832_v48 = vmul.f32 0.0051020407, %v783_v5  ;;  %v874_v49 = vadd.f32 1e-05, %v842_v53  ;;  %v919_v53 = vld [vmem:[%s3908_s3 + $0x58] sm:$0xff] }
 0x27e   :  { %2263 = vrsqrt.f32 %v872_v14 }
 0x27f   :  { %2265 = vrsqrt.f32 %v866_v47  ;;  %v855_v47 = vld [vmem:[%s3907_s2 + $0x58] sm:$0xff] }
 0x280   :  { %v775_v44 = vpop.xlane.xlu1 %774  ;;  %2267 = vrsqrt.f32 %v865_v50 }
 0x281   :  { %2269 = vrsqrt.f32 %v873_v20  ;;  %v856_v20 = vld [vmem:[%s3907_s2 + $0x60] sm:$0xff] }
 0x282   :  { %v2252_v45 = vpop.eup %2251 }
 0x283   :  { %v901_v23 = vmul.f32 %v2252_v45, %v853_v29  ;;  %v854_v29 = vld [vmem:[%s3907_s2 + $0x50] sm:$0xff] }
 0x285   :  { %v933_v57 = vmul.f32 %v901_v23, %v3023_v41 }
 0x286   :  { %v2254_v11 = vpop.eup %2253 }
 0x287   :  { %v2256_v6 = vpop.eup %2255  ;;  %v900_v43 = vmul.f32 %v2254_v11, %v852_v15  ;;  %v917_v15 = vld [vmem:[%s3908_s3 + $0x48] sm:$0xff] }
 0x288   :  { %v3102_v59 = vmul.f32 %v2256_v6, %v851_v52  ;;  %v2258_v45 = vpop.eup %2257  ;;  %v949_v52 = vsub.f32 %v917_v15, %v933_v57  ;;  %v864_v6 = vadd.f32 1e-05, %v832_v48 }
 0x289   :  { %v932_v10 = vmul.f32 %v900_v43, %v3009_v63  ;;  %v779_v63 = vpop.xlane.xlu0 %778  ;;  %v902_v11 = vmul.f32 %v2258_v45, %v854_v29  ;;  %v2260_v41 = vpop.eup %2259 }
 0x28a   :  { %993 = vperm.xlu0 %2249, %v3102_v59   ;;  %v831_v14 = vmul.f32 0.0051020407, %v779_v63  ;;  %2271 = vrsqrt.f32 %v864_v6  ;;  %v2262_v57 = vpop.eup %2261  ;;  %v767_v45 = vpop.xlane.xlu1 %766 }
 0x28b   :  { %v948_v3 = vsub.f32 %v916_v54, %v932_v10  ;;  %v903_v54 = vmul.f32 %v2260_v41, %v855_v47  ;;  %v830_v10 = vmul.f32 0.0051020407, %v775_v44  ;;  %v828_v29 = vmul.f32 0.0051020407, %v767_v45 }
 0x28c   :  { %v863_v5 = vadd.f32 1e-05, %v831_v14 }
 0x28d   :  { %1110 = vperm.xlu1 %2250, %v948_v3   ;;  %v771_v13 = vpop.xlane.xlu0 %770  ;;  %v918_v3 = vld [vmem:[%s3908_s3 + $0x50] sm:$0xff]  ;;  %v862_v15 = vadd.f32 1e-05, %v830_v10  ;;  %v935_v6 = vmul.f32 %v903_v54, %v3011_v46  ;;  %v860_v14 = vadd.f32 1e-05, %v828_v29 }
 0x28e   :  { %998 = vperm.xlu0 %2249, %v900_v43   ;;  %v934_v43 = vmul.f32 %v902_v11, %v2987_v37  ;;  %v829_v50 = vmul.f32 0.0051020407, %v771_v13  ;;  %v2264_v37 = vpop.eup %2263  ;;  %2273 = vrsqrt.f32 %v863_v5  ;;  %v849_v5 = vld [vmem:[%s3907_s2 + $0x28] sm:$0xff] }
 0x28f   :  { %v2266_v44 = vpop.eup %2265  ;;  %2275 = vrsqrt.f32 %v874_v49  ;;  %v904_v41 = vmul.f32 %v2264_v37, %v856_v20  ;;  %v951_v10 = vsub.f32 %v919_v53, %v935_v6  ;;  %v847_v37 = vld [vmem:[%s3907_s2 + $0x18] sm:$0xff]  ;;  %v921_v53 = vld [vmem:[%s3908_s3 + $0x68] sm:$0xff] }
 0x290   :  { %v950_v48 = vsub.f32 %v918_v3, %v934_v43  ;;  %2277 = vrsqrt.f32 %v862_v15  ;;  %v2268_v43 = vpop.eup %2267 }
 0x291   :  { %1115 = vperm.xlu1 %2250, %v949_v52   ;;  %v850_v52 = vld [vmem:[%s3907_s2 + $0x30] sm:$0xff]  ;;  %v2270_v13 = vpop.eup %2269  ;;  %v897_v46 = vmul.f32 %v2268_v43, %v849_v5  ;;  %v845_v5 = vld [vmem:[%s3907_s2 + $0x8] sm:$0xff] }
 0x292   :  { %1003 = vperm.xlu0 %2249, %v901_v23   ;;  %v859_v23 = vld [vmem:[%s3907_s2 + $0x78] sm:$0xff]  ;;  %v3134_v47 = vmul.f32 %v2266_v44, %v850_v52  ;;  %v858_v44 = vld [vmem:[%s3907_s2 + $0x70] sm:$0xff] }
 0x293   :  { %v907_v63 = vmul.f32 %v2262_v57, %v859_v23  ;;  %v848_v57 = vld [vmem:[%s3907_s2 + $0x20] sm:$0xff]  ;;  %v936_v23 = vmul.f32 %v904_v41, %v2981_v25  ;;  %v846_v52 = vld [vmem:[%s3907_s2 + $0x10] sm:$0xff] }
 0x295   :  { %1013 = vperm.xlu1 %2250, %v903_v54   ;;  %v857_v54 = vld [vmem:[%s3907_s2 + $0x68] sm:$0xff] }
 0x296   :  { %1008 = vperm.xlu0 %2249, %v902_v11   ;;  %v861_v11 = vadd.f32 1e-05, %v829_v50  ;;  %v905_v45 = vmul.f32 %v2270_v13, %v857_v54  ;;  %v920_v50 = vld [vmem:[%s3908_s3 + $0x60] sm:$0xff] }
 0x297   :  { %v2272_v3 = vpop.eup %2271  ;;  %v952_v15 = vsub.f32 %v920_v50, %v936_v23  ;;  %v939_v23 = vmul.f32 %v907_v63, %v2985_v60  ;;  %v923_v50 = vld [vmem:[%s3908_s3 + $0x78] sm:$0xff] }
 0x298   :  { %2279 = vrsqrt.f32 %v861_v11  ;;  %v896_v49 = vmul.f32 %v2272_v3, %v848_v57  ;;  %v922_v3 = vld [vmem:[%s3908_s3 + $0x70] sm:$0xff]  ;;  %v915_v60 = vld [vmem:[%s3908_s3 + $0x38] sm:$0xff] }
 0x299   :  { %1120 = vperm.xlu1 %2250, %v950_v48   ;;  %2281 = vrsqrt.f32 %v860_v14 }
 0x29a   :  { %1033 = vperm.xlu0 %2249, %v907_v63  }
 0x29b   :  { %v2274_v48 = vpop.eup %2273 }
 0x29c   :  { %v2276_v29 = vpop.eup %2275  ;;  %v895_v20 = vmul.f32 %v2274_v48, %v847_v37  ;;  %v955_v37 = vsub.f32 %v923_v50, %v939_v23 }
 0x29d   :  { %1018 = vperm.xlu1 %2250, %v904_v41   ;;  %v2278_v25 = vpop.eup %2277  ;;  %v906_v11 = vmul.f32 %v2276_v29, %v858_v44  ;;  %v937_v41 = vmul.f32 %v905_v45, %v2979_v2  ;;  %v914_v44 = vld [vmem:[%s3908_s3 + $0x30] sm:$0xff] }
 0x29e   :  { %988 = vperm.xlu0 %2249, %v3134_v47   ;;  %v894_v14 = vmul.f32 %v2278_v25, %v846_v52  ;;  %v929_v52 = vmul.f32 %v897_v46, %v3052_v12  ;;  %v911_v12 = vld [vmem:[%s3908_s3 + $0x18] sm:$0xff] }
 0x29f   :  { %v953_v13 = vsub.f32 %v921_v53, %v937_v41  ;;  %v938_v2 = vmul.f32 %v906_v11, %v2997_v24  ;;  %v908_v24 = vld [vmem:[%s3908_s3] sm:$0xff]  ;;  %v927_v41 = vmul.f32 %v895_v20, %v3067_v17  ;;  %v909_v17 = vld [vmem:[%s3908_s3 + $0x8] sm:$0xff] }
 0x2a1   :  { %1125 = vperm.xlu1 %2250, %v951_v10   ;;  %v844_v10 = vld [vmem:[%s3907_s2] sm:$0xff] }
 0x2a2   :  { %983 = vperm.xlu0 %2249, %v897_v46   ;;  %v943_v46 = vsub.f32 %v911_v12, %v927_v41 }
 0x2a5   :  { %1023 = vperm.xlu1 %2250, %v905_v45   ;;  %v2280_v6 = vpop.eup %2279  ;;  %v954_v45 = vsub.f32 %v922_v3, %v938_v2 }
 0x2a6   :  { %978 = vperm.xlu0 %2249, %v896_v49   ;;  %v2282_v43 = vpop.eup %2281  ;;  %v893_v54 = vmul.f32 %v2280_v6, %v845_v5  ;;  %v926_v6 = vmul.f32 %v894_v14, %v3048_v51 }
 0x2a7   :  { %v892_v57 = vmul.f32 %v2282_v43, %v844_v10 }
 0x2a8   :  { %v925_v53 = vmul.f32 %v893_v54, %v3077_v30 }
 0x2a9   :  { %1130 = vperm.xlu1 %2250, %v952_v15   ;;  %v924_v48 = vmul.f32 %v892_v57, %v3065_v8  ;;  %v931_v15 = vmul.f32 %v3102_v59, %v3039_v22  ;;  %v930_v8 = vmul.f32 %v3134_v47, %v3015_v32  ;;  %v913_v22 = vld [vmem:[%s3908_s3 + $0x28] sm:$0xff]  ;;  %v912_v32 = vld [vmem:[%s3908_s3 + $0x20] sm:$0xff] }
 0x2aa   :  { %973 = vperm.xlu0 %2249, %v895_v20   ;;  %v945_v59 = vsub.f32 %v913_v22, %v929_v52  ;;  %v941_v20 = vsub.f32 %v909_v17, %v925_v53 }
 0x2ab   :  { %v940_v29 = vsub.f32 %v908_v24, %v924_v48  ;;  %v947_v63 = vsub.f32 %v915_v60, %v931_v15  ;;  %v946_v25 = vsub.f32 %v914_v44, %v930_v8 }
 0x2ad   :  { %1028 = vperm.xlu1 %2250, %v906_v11   ;;  %v928_v11 = vmul.f32 %v896_v49, %v3035_v58  ;;  %v910_v58 = vld [vmem:[%s3908_s3 + $0x10] sm:$0xff] }
 0x2ae   :  { %968 = vperm.xlu0 %2249, %v894_v14   ;;  %v942_v49 = vsub.f32 %v910_v58, %v926_v6 }
 0x2af   :  { %v944_v47 = vsub.f32 %v912_v32, %v928_v11 }
 0x2b1   :  { %1135 = vperm.xlu1 %2250, %v953_v13  }
 0x2b2   :  { %963 = vperm.xlu0 %2249, %v893_v54  }
 0x2b5   :  { %1140 = vperm.xlu1 %2250, %v954_v45  }
 0x2b6   :  { %958 = vperm.xlu0 %2249, %v892_v57  }
 0x2b9   :  { %1145 = vperm.xlu1 %2250, %v955_v37  }
 0x2ba   :  { %1070 = vperm.xlu0 %2249, %v940_v29  }
 0x2bd   :  { %1105 = vperm.xlu1 %2250, %v947_v63  }
 0x2c1   :  { %1100 = vperm.xlu1 %2250, %v946_v25  }
 0x2c5   :  { %1095 = vperm.xlu1 %2250, %v945_v59  }
 0x2c9   :  { %1090 = vperm.xlu1 %2250, %v944_v47  }
 0x2cd   :  { %1085 = vperm.xlu1 %2250, %v943_v46  }
 0x2d1   :  { %1080 = vperm.xlu1 %2250, %v942_v49  }
 0x2d5   :  { %1075 = vperm.xlu1 %2250, %v941_v20  }
 0x305   :  { %v3214_v43 = vpop.permute.xlu0 %993 }
 0x308   :  { %v3216_v5 = vpop.permute.xlu1 %1110 }
 0x309   :  { %v3218_v51 = vpop.permute.xlu0 %998 }
 0x30c   :  { %v3220_v14 = vpop.permute.xlu1 %1115 }
 0x30d   :  { %v1004_v13 = vpop.permute.xlu0 %1003 }
 0x310   :  { %v1014_v10 = vpop.permute.xlu1 %1013 }
 0x311   :  { %v1009_v3 = vpop.permute.xlu0 %1008  ;;  %v1059_v58 = vmul.f32 %v1014_v10, %v2898_v36  ;;  %v1054_v36 = vmul.f32 %v1004_v13, %v2945_v16 }
 0x312   :  { %v1057_v20 = vmul.f32 %v1009_v3, %v2872_v55 }
 0x314   :  { %v1121_v2 = vpop.permute.xlu1 %1120 }
 0x315   :  { %v1034_v57 = vpop.permute.xlu0 %1033 }
 0x316   :  { %v1066_v60 = vmul.f32 %v1034_v57, %v2889_v35  ;;  %v1067_v63 = vmul.f32 %v1034_v57, %v2883_v33 }
 0x318   :  { %v1019_v30 = vpop.permute.xlu1 %1018 }
 0x319   :  { %v3222_v23 = vpop.permute.xlu0 %988  ;;  %v1061_v12 = vmul.f32 %v1019_v30, %v2863_v38  ;;  %v1055_v38 = vmul.f32 %v1004_v13, %v2916_v19  ;;  %v1053_v19 = vmul.f32 %v3218_v51, %v2879_v28 }
 0x31c   :  { %v1126_v54 = vpop.permute.xlu1 %1125 }
 0x31d   :  { %v3224_v24 = vpop.permute.xlu0 %983  ;;  %v1171_v57 = vadd.f32 %v1126_v54, %v1059_v58 }
 0x320   :  { %v1024_v45 = vpop.permute.xlu1 %1023 }
 0x321   :  { %v3226_v15 = vpop.permute.xlu0 %978  ;;  %v1063_v52 = vmul.f32 %v1024_v45, %v2865_v39  ;;  %v1062_v32 = vmul.f32 %v1024_v45, %v2867_v40  ;;  %v1058_v40 = vmul.f32 %v1014_v10, %v2927_v34 }
 0x323   :  { %v1170_v45 = vadd.f32 %v1126_v54, %v1058_v40  ;;  %v1166_v54 = vadd.f32 %v3220_v14, %v1054_v36 }
 0x324   :  { %v1131_v50 = vpop.permute.xlu1 %1130 }
 0x325   :  { %v3234_v47 = vpop.permute.xlu0 %973  ;;  %v1173_v39 = vadd.f32 %v1131_v50, %v1061_v12 }
 0x327   :  { %v1205_v55 = vmax.f32 %v1173_v39, 0.0 }
 0x328   :  { %v1029_v48 = vpop.permute.xlu1 %1028 }
 0x329   :  { %v1065_v8 = vmul.f32 %v1029_v48, %v2881_v31  ;;  %v1064_v44 = vmul.f32 %v1029_v48, %v2907_v42  ;;  %v1060_v31 = vmul.f32 %v1019_v30, %v2876_v61  ;;  %v1056_v30 = vmul.f32 %v1009_v3, %v2887_v27  ;;  %v3244_v48 = vpop.permute.xlu0 %968 }
 0x32a   :  { %v1167_v27 = vadd.f32 %v3220_v14, %v1055_v38  ;;  %v1203_v3 = vmax.f32 %v1171_v57, 0.0  ;;  %v1049_v14 = vmul.f32 %v3222_v23, %v2896_v21 }
 0x32b   :  { %v1172_v53 = vadd.f32 %v1131_v50, %v1060_v31  ;;  %v1169_v50 = vadd.f32 %v1121_v2, %v1057_v20  ;;  %v1168_v16 = vadd.f32 %v1121_v2, %v1056_v30  ;;  %v1050_v2 = vmul.f32 %v3214_v43, %v2959_v0 }
 0x32c   :  { %v1136_v37 = vpop.permute.xlu1 %1135 }
 0x32d   :  { %v1175_v35 = vadd.f32 %v1136_v37, %v1063_v52  ;;  %v1174_v6 = vadd.f32 %v1136_v37, %v1062_v32  ;;  %v1052_v37 = vmul.f32 %v3218_v51, %v2905_v26  ;;  %v1204_v13 = vmax.f32 %v1172_v53, 0.0 }
 0x32e   :  { %v1165_v26 = vadd.f32 %v3216_v5, %v1053_v19  ;;  %v1201_v51 = vmax.f32 %v1169_v50, 0.0  ;;  %v1198_v52 = vmax.f32 %v1166_v54, 0.0  ;;  %v3930_v50 = vld [vmem:[#allocation5_spill] sm:$0xff] }
 0x32f   :  { %v1207_v61 = vmax.f32 %v1175_v35, 0.0  ;;  %v1206_v34 = vmax.f32 %v1174_v6, 0.0  ;;  %v3929_v6 = vld [vmem:[#allocation8_spill] sm:$0xff] }
 0x330   :  { %v1141_v29 = vpop.permute.xlu1 %1140  ;;  %v1197_v32 = vmax.f32 %v1165_v26, 0.0 }
 0x331   :  { %v1177_v22 = vadd.f32 %v1141_v29, %v1065_v8  ;;  %v1176_v41 = vadd.f32 %v1141_v29, %v1064_v44  ;;  %v1202_v29 = vmax.f32 %v1170_v45, 0.0  ;;  %v1200_v8 = vmax.f32 %v1168_v16, 0.0  ;;  %v3258_v44 = vpop.permute.xlu0 %963  ;;  %v3932_v16 = vld [vmem:[#allocation3_spill] sm:$0xff] }
 0x333   :  { %v1209_v49 = vmax.f32 %v1177_v22, 0.0  ;;  %v1208_v17 = vmax.f32 %v1176_v41, 0.0  ;;  %v3926_v22 = vld [vmem:[#allocation7_spill] sm:$0xff]  ;;  %v3927_v41 = vld [vmem:[#allocation9_spill] sm:$0xff] }
 0x334   :  { %v1146_v25 = vpop.permute.xlu1 %1145  ;;  %v1046_v12 = vmul.f32 %v3224_v24, %v3927_v41  ;;  %v1218_v41 = vld [vmem:[%s3909_s4 + $0x30] sm:$0xff] }
 0x335   :  { %v1178_v59 = vadd.f32 %v1146_v25, %v1066_v60  ;;  %v1179_v11 = vadd.f32 %v1146_v25, %v1067_v63  ;;  %v1051_v60 = vmul.f32 %v3214_v43, %v2933_v9  ;;  %v1164_v63 = vadd.f32 %v3216_v5, %v1052_v37 }
 0x336   :  { %v1199_v9 = vmax.f32 %v1167_v27, 0.0  ;;  %v1047_v43 = vmul.f32 %v3224_v24, %v2951_v18  ;;  %v1044_v18 = vmul.f32 %v3226_v15, %v3929_v6  ;;  %v1043_v24 = vmul.f32 %v3234_v47, %v2843_v7  ;;  %v1234_v6 = vld [vmem:[%s3909_s4 + $0xb0] sm:$0xff] }
 0x337   :  { %v1210_v46 = vmax.f32 %v1178_v59, 0.0  ;;  %v1211_v33 = vmax.f32 %v1179_v11, 0.0  ;;  %v1048_v59 = vmul.f32 %v3222_v23, %v3926_v22  ;;  %v1196_v21 = vmax.f32 %v1164_v63, 0.0  ;;  %v1214_v22 = vld [vmem:[%s3909_s4 + $0x10] sm:$0xff] }
 0x338   :  { %v1106_v42 = vpop.permute.xlu1 %1105  ;;  %v1040_v7 = vmul.f32 %v3244_v48, %v2833_v62  ;;  %v1039_v62 = vmul.f32 %v3258_v44, %v3930_v50 }
 0x339   :  { %1248 = vmatprep.subr.mxu0 %v1211_v33  ;;  %2207 = vmatprep.subr.mxu1 %v1211_v33  ;;  %v1163_v25 = vadd.f32 %v1106_v42, %v1051_v60  ;;  %v1162_v11 = vadd.f32 %v1106_v42, %v1050_v2  ;;  %v959_v42 = vpop.permute.xlu0 %958 }
 0x33a   :  { %1249 = vmatpush1.msra.mxu0 %v1210_v46  ;;  %2223 = vmatpush1.msra.mxu1 %v1210_v46  ;;  %v3928_v46 = vld [vmem:[#allocation6_spill] sm:$0xff] }
 0x33b   :  { %1250 = vmatprep.subr.mxu0 %v1209_v49  ;;  %2208 = vmatprep.subr.mxu1 %v1209_v49  ;;  %v1045_v23 = vmul.f32 %v3226_v15, %v3928_v46  ;;  %v1195_v33 = vmax.f32 %v1163_v25, 0.0  ;;  %v1194_v58 = vmax.f32 %v1162_v11, 0.0  ;;  %v1041_v15 = vmul.f32 %v3244_v48, %v2837_v1  ;;  %v3931_v48 = vld [vmem:[#allocation4_spill] sm:$0xff]  ;;  %v1215_v11 = vld [vmem:[%s3909_s4 + $0x18] sm:$0xff]  ;;  %v1232_v46 = vld [vmem:[%s3909_s4 + $0xa0] sm:$0xff] }
 0x33c   :  { %v1101_v10 = vpop.permute.xlu1 %1100  ;;  %1251 = vmatpush1.msra.mxu0 %v1208_v17  ;;  %2224 = vmatpush1.msra.mxu1 %v1208_v17  ;;  %v1042_v17 = vmul.f32 %v3234_v47, %v2839_v4  ;;  %v1038_v1 = vmul.f32 %v3258_v44, %v2827_v56  ;;  %v1212_v44 = vld [vmem:[%s3909_s4] sm:$0xff]  ;;  %v3292_v25 = vld [vmem:[#allocation2 + $0x8] sm:$0xff] }
 0x33d   :  { %1252 = vmatprep.subr.mxu0 %v1207_v61  ;;  %2209 = vmatprep.subr.mxu1 %v1207_v61  ;;  %v1161_v5 = vadd.f32 %v1101_v10, %v1049_v14  ;;  %v1160_v35 = vadd.f32 %v1101_v10, %v1048_v59  ;;  %v1225_v14 = vld [vmem:[%s3909_s4 + $0x68] sm:$0xff]  ;;  %v1227_v59 = vld [vmem:[%s3909_s4 + $0x78] sm:$0xff] }
 0x33e   :  { %1253 = vmatpush1.msra.mxu0 %v1206_v34  ;;  %2225 = vmatpush1.msra.mxu1 %v1206_v34  ;;  %v1071_v34 = vpop.permute.xlu0 %1070 }
 0x33f   :  { %1254 = vmatprep.subr.mxu0 %v1205_v55  ;;  %2210 = vmatprep.subr.mxu1 %v1205_v55  ;;  %v1193_v40 = vmax.f32 %v1161_v5, 0.0  ;;  %v1192_v38 = vmax.f32 %v1160_v35, 0.0  ;;  %v1037_v55 = vmul.f32 %v959_v42, %v3931_v48  ;;  %v1229_v5 = vld [vmem:[%s3909_s4 + $0x88] sm:$0xff]  ;;  %v1219_v35 = vld [vmem:[%s3909_s4 + $0x38] sm:$0xff] }
 0x340   :  { %v1096_v28 = vpop.permute.xlu1 %1095  ;;  %1255 = vmatpush1.msra.mxu0 %v1204_v13  ;;  %2226 = vmatpush1.msra.mxu1 %v1204_v13  ;;  %v1036_v13 = vmul.f32 %v959_v42, %v3932_v16  ;;  %v1235_v42 = vld [vmem:[%s3909_s4 + $0xb8] sm:$0xff] }
 0x341   :  { %1256 = vmatprep.subr.mxu0 %v1203_v3  ;;  %2211 = vmatprep.subr.mxu1 %v1203_v3  ;;  %v1159_v31 = vadd.f32 %v1096_v28, %v1047_v43  ;;  %v1158_v39 = vadd.f32 %v1096_v28, %v1046_v12  ;;  %v1149_v54 = vadd.f32 %v1071_v34, %v1037_v55  ;;  %v1216_v43 = vld [vmem:[%s3909_s4 + $0x20] sm:$0xff]  ;;  %v1231_v12 = vld [vmem:[%s3909_s4 + $0x98] sm:$0xff] }
 0x342   :  { %1257 = vmatpush1.msra.mxu0 %v1202_v29  ;;  %2227 = vmatpush1.msra.mxu1 %v1202_v29  ;;  %v1148_v56 = vadd.f32 %v1071_v34, %v1036_v13 }
 0x343   :  { %1258 = vmatprep.subr.mxu0 %v1201_v51  ;;  %2212 = vmatprep.subr.mxu1 %v1201_v51  ;;  %v1191_v57 = vmax.f32 %v1159_v31, 0.0  ;;  %v1190_v36 = vmax.f32 %v1158_v39, 0.0  ;;  %v1181_v63 = vmax.f32 %v1149_v54, 0.0  ;;  %v1221_v31 = vld [vmem:[%s3909_s4 + $0x48] sm:$0xff]  ;;  %v1236_v39 = vld [vmem:[%s3909_s4 + $0xc0] sm:$0xff] }
 0x344   :  { %v1091_v0 = vpop.permute.xlu1 %1090  ;;  %1259 = vmatpush1.msra.mxu0 %v1200_v8  ;;  %2228 = vmatpush1.msra.mxu1 %v1200_v8  ;;  %v1180_v8 = vmax.f32 %v1148_v56, 0.0 }
 0x345   :  { %1260 = vmatprep.subr.mxu0 %v1199_v9  ;;  %2213 = vmatprep.subr.mxu1 %v1199_v9  ;;  %v1157_v53 = vadd.f32 %v1091_v0, %v1045_v23  ;;  %v1156_v20 = vadd.f32 %v1091_v0, %v1044_v18  ;;  %v1213_v9 = vld [vmem:[%s3909_s4 + $0x8] sm:$0xff]  ;;  %v1228_v0 = vld [vmem:[%s3909_s4 + $0x80] sm:$0xff]  ;;  %v1222_v18 = vld [vmem:[%s3909_s4 + $0x50] sm:$0xff] }
 0x346   :  { %1261 = vmatpush1.msra.mxu0 %v1198_v52  ;;  %2229 = vmatpush1.msra.mxu1 %v1198_v52  ;;  %v1226_v52 = vld [vmem:[%s3909_s4 + $0x70] sm:$0xff]  ;;  %v1220_v23 = vld [vmem:[%s3909_s4 + $0x40] sm:$0xff] }
 0x347   :  { %1262 = vmatprep.subr.mxu0 %v1197_v32  ;;  %2214 = vmatprep.subr.mxu1 %v1197_v32  ;;  %v1189_v4 = vmax.f32 %v1157_v53, 0.0  ;;  %v1188_v10 = vmax.f32 %v1156_v20, 0.0  ;;  %v1217_v32 = vld [vmem:[%s3909_s4 + $0x28] sm:$0xff]  ;;  %v1239_v53 = vld [vmem:[%s3909_s4 + $0xd8] sm:$0xff]  ;;  %v1242_v20 = vld [vmem:[%s3909_s4 + $0xf0] sm:$0xff] }
 0x348   :  { %v1086_v49 = vpop.permute.xlu1 %1085  ;;  %1263 = vmatpush1.msra.mxu0 %v1196_v21  ;;  %2230 = vmatpush1.msra.mxu1 %v1196_v21  ;;  %v1230_v21 = vld [vmem:[%s3909_s4 + $0x90] sm:$0xff] }
 0x349   :  { %1264 = vmatprep.subr.mxu0 %v1195_v33  ;;  %2215 = vmatprep.subr.mxu1 %v1195_v33  ;;  %v1155_v61 = vadd.f32 %v1086_v49, %v1043_v24  ;;  %v1154_v30 = vadd.f32 %v1086_v49, %v1042_v17  ;;  %v1233_v33 = vld [vmem:[%s3909_s4 + $0xa8] sm:$0xff]  ;;  %v1224_v49 = vld [vmem:[%s3909_s4 + $0x60] sm:$0xff] }
 0x34a   :  { %1265 = vmatpush1.msra.mxu0 %v1194_v58  ;;  %2231 = vmatpush1.msra.mxu1 %v1194_v58  ;;  %v1223_v58 = vld [vmem:[%s3909_s4 + $0x58] sm:$0xff]  ;;  %v1237_v24 = vld [vmem:[%s3909_s4 + $0xc8] sm:$0xff]  ;;  %v1240_v17 = vld [vmem:[%s3909_s4 + $0xe0] sm:$0xff] }
 0x34b   :  { %1266 = vmatprep.subr.mxu0 %v1193_v40  ;;  %2216 = vmatprep.subr.mxu1 %v1193_v40  ;;  %v1187_v37 = vmax.f32 %v1155_v61, 0.0  ;;  %v1186_v27 = vmax.f32 %v1154_v30, 0.0  ;;  %v1238_v40 = vld [vmem:[%s3909_s4 + $0xd0] sm:$0xff]  ;;  %v1245_v61 = vld [vmem:[%s3909_s4 + $0x108] sm:$0xff] }
 0x34c   :  { %v1081_v45 = vpop.permute.xlu1 %1080  ;;  %1267 = vmatpush1.msra.mxu0 %v1192_v38  ;;  %2232 = vmatpush1.msra.mxu1 %v1192_v38  ;;  %v1241_v38 = vld [vmem:[%s3909_s4 + $0xe8] sm:$0xff] }
 0x34d   :  { %v1153_v47 = vadd.f32 %v1081_v45, %v1041_v15  ;;  %1268 = vmatprep.subr.mxu0 %v1191_v57  ;;  %2217 = vmatprep.subr.mxu1 %v1191_v57  ;;  %v1152_v19 = vadd.f32 %v1081_v45, %v1040_v7  ;;  %v1243_v15 = vld [vmem:[%s3909_s4 + $0xf8] sm:$0xff]  ;;  %v1244_v57 = vld [vmem:[%s3909_s4 + $0x100] sm:$0xff]  ;;  %v1246_v7 = vld [vmem:[%s3909_s4 + $0x110] sm:$0xff] }
 0x34e   :  { %1269 = vmatpush1.msra.mxu0 %v1190_v36  ;;  %2233 = vmatpush1.msra.mxu1 %v1190_v36  ;;  %v1247_v36 = vld [vmem:[%s3909_s4 + $0x118] sm:$0xff]  ;;  %s2288_s4 = smov 14  }
 0x34f   :  { %1270 = vmatprep.subr.mxu0 %v1189_v4  ;;  %2218 = vmatprep.subr.mxu1 %v1189_v4  ;;  %v1185_v29 = vmax.f32 %v1153_v47, 0.0  ;;  %v1184_v26 = vmax.f32 %v1152_v19, 0.0 }
 0x350   :  { %v1076_v3 = vpop.permute.xlu1 %1075  ;;  %1271 = vmatpush1.msra.mxu0 %v1188_v10  ;;  %2234 = vmatpush1.msra.mxu1 %v1188_v10 }
 0x351   :  { %v1150_v28 = vadd.f32 %v1076_v3, %v1038_v1  ;;  %v1151_v60 = vadd.f32 %v1076_v3, %v1039_v62  ;;  %1272 = vmatprep.subr.mxu0 %v1187_v37  ;;  %2219 = vmatprep.subr.mxu1 %v1187_v37 }
 0x352   :  { %1273 = vmatpush1.msra.mxu0 %v1186_v27  ;;  %2235 = vmatpush1.msra.mxu1 %v1186_v27 }
 0x353   :  { %v1182_v51 = vmax.f32 %v1150_v28, 0.0  ;;  %v1183_v2 = vmax.f32 %v1151_v60, 0.0  ;;  %1274 = vmatprep.subr.mxu0 %v1185_v29  ;;  %2220 = vmatprep.subr.mxu1 %v1185_v29 }
 0x354   :  { %1275 = vmatpush1.msra.mxu0 %v1184_v26  ;;  %2236 = vmatpush1.msra.mxu1 %v1184_v26 }
 0x355   :  { %1276 = vmatprep.subr.mxu0 %v1183_v2  ;;  %2221 = vmatprep.subr.mxu1 %v1183_v2 }
 0x356   :  { %1277 = vmatpush1.msra.mxu0 %v1182_v51  ;;  %2237 = vmatpush1.msra.mxu1 %v1182_v51 }
 0x357   :  { %1278 = vmatprep.subr.mxu0 %v1181_v63  ;;  %2222 = vmatprep.subr.mxu1 %v1181_v63 }
 0x358   :  { %1279 = vmatpush1.msra.mxu0 %v1180_v8  ;;  %2238 = vmatpush1.msra.mxu1 %v1180_v8 }
 0x359   :  { %1313 = vmatmul.mubr.f32.vlgmr.msra.gmra.mxu0 %v1212_v44  ;;  %1391 = vmatmul.mubr.f32.vlgmr.msra.gmra.mxu1 %v1225_v14 }
 0x35a   :  { %1318 = vmatprep.mubr.f32.mxu0 %v3292_v25  ;;  %1396 = vmatprep.mubr.f32.mxu1 %v3292_v25 }
 0x35d   :  { %1319 = vmatmul.mubr.f32.gmra.mxu0 %v1213_v9  ;;  %1397 = vmatmul.mubr.f32.gmra.mxu1 %v1226_v52 }
 0x35e   :  { %1324 = vmatprep.mubr.f32.mxu0 %v3292_v25  ;;  %1402 = vmatprep.mubr.f32.mxu1 %v3292_v25 }
 0x361   :  { %1325 = vmatmul.mubr.f32.gmra.mxu0 %v1214_v22  ;;  %1403 = vmatmul.mubr.f32.gmra.mxu1 %v1227_v59 }
 0x362   :  { %1330 = vmatprep.mubr.f32.mxu0 %v3292_v25  ;;  %1408 = vmatprep.mubr.f32.mxu1 %v3292_v25 }
 0x365   :  { %1331 = vmatmul.mubr.f32.gmra.mxu0 %v1215_v11  ;;  %1409 = vmatmul.mubr.f32.gmra.mxu1 %v1228_v0 }
 0x366   :  { %1336 = vmatprep.mubr.f32.mxu0 %v3292_v25  ;;  %1414 = vmatprep.mubr.f32.mxu1 %v3292_v25 }
 0x369   :  { %1337 = vmatmul.mubr.f32.gmra.mxu0 %v1216_v43  ;;  %1415 = vmatmul.mubr.f32.gmra.mxu1 %v1229_v5 }
 0x36a   :  { %1342 = vmatprep.mubr.f32.mxu0 %v3292_v25  ;;  %1420 = vmatprep.mubr.f32.mxu1 %v3292_v25 }
 0x36d   :  { %1343 = vmatmul.mubr.f32.gmra.mxu0 %v1217_v32  ;;  %1421 = vmatmul.mubr.f32.gmra.mxu1 %v1230_v21 }
 0x36e   :  { %1348 = vmatprep.mubr.f32.mxu0 %v3292_v25  ;;  %1426 = vmatprep.mubr.f32.mxu1 %v3292_v25 }
 0x371   :  { %1349 = vmatmul.mubr.f32.gmra.mxu0 %v1218_v41  ;;  %1427 = vmatmul.mubr.f32.gmra.mxu1 %v1231_v12 }
 0x372   :  { %1354 = vmatprep.mubr.f32.mxu0 %v3292_v25  ;;  %1432 = vmatprep.mubr.f32.mxu1 %v3292_v25 }
 0x375   :  { %1355 = vmatmul.mubr.f32.gmra.mxu0 %v1219_v35  ;;  %1433 = vmatmul.mubr.f32.gmra.mxu1 %v1232_v46 }
 0x376   :  { %1360 = vmatprep.mubr.f32.mxu0 %v3292_v25  ;;  %1438 = vmatprep.mubr.f32.mxu1 %v3292_v25 }
 0x379   :  { %1361 = vmatmul.mubr.f32.gmra.mxu0 %v1220_v23  ;;  %1439 = vmatmul.mubr.f32.gmra.mxu1 %v1233_v33 }
 0x37a   :  { %1366 = vmatprep.mubr.f32.mxu0 %v3292_v25  ;;  %1444 = vmatprep.mubr.f32.mxu1 %v3292_v25 }
 0x37d   :  { %1367 = vmatmul.mubr.f32.gmra.mxu0 %v1221_v31  ;;  %1445 = vmatmul.mubr.f32.gmra.mxu1 %v1234_v6 }
 0x37e   :  { %1372 = vmatprep.mubr.f32.mxu0 %v3292_v25  ;;  %1450 = vmatprep.mubr.f32.mxu1 %v3292_v25 }
 0x381   :  { %1373 = vmatmul.mubr.f32.gmra.mxu0 %v1222_v18  ;;  %1451 = vmatmul.mubr.f32.gmra.mxu1 %v1235_v42 }
 0x382   :  { %1378 = vmatprep.mubr.f32.mxu0 %v3292_v25  ;;  %1456 = vmatprep.mubr.f32.mxu1 %v3292_v25 }
 0x385   :  { %1379 = vmatmul.mubr.f32.gmra.mxu0 %v1223_v58  ;;  %1457 = vmatmul.mubr.f32.gmra.mxu1 %v1236_v39 }
 0x386   :  { %1384 = vmatprep.mubr.f32.mxu0 %v3292_v25  ;;  %1462 = vmatprep.mubr.f32.mxu1 %v3292_v25 }
 0x389   :  { %1385 = vmatmul.mubr.f32.gmra.mxu0 %v1224_v49  ;;  %1463 = vmatmul.mubr.f32.gmra.mxu1 %v1237_v24 }
 0x38a   :  { %1468 = vmatprep.mubr.f32.mxu1 %v3292_v25 }
 0x38d   :  { %1469 = vmatmul.mubr.f32.gmra.mxu1 %v1238_v40 }
 0x38e   :  { %1474 = vmatprep.mubr.f32.mxu1 %v3292_v25 }
 0x391   :  { %1475 = vmatmul.mubr.f32.gmra.mxu1 %v1239_v53 }
 0x392   :  { %1480 = vmatprep.mubr.f32.mxu1 %v3292_v25 }
 0x395   :  { %1481 = vmatmul.mubr.f32.gmra.mxu1 %v1240_v17 }
 0x396   :  { %1486 = vmatprep.mubr.f32.mxu1 %v3292_v25 }
 0x399   :  { %1487 = vmatmul.mubr.f32.gmra.mxu1 %v1241_v38 }
 0x39a   :  { %1492 = vmatprep.mubr.f32.mxu1 %v3292_v25 }
 0x39d   :  { %1493 = vmatmul.mubr.f32.gmra.mxu1 %v1242_v20 }
 0x39e   :  { %1498 = vmatprep.mubr.f32.mxu1 %v3292_v25 }
 0x3a1   :  { %1499 = vmatmul.mubr.f32.gmra.mxu1 %v1243_v15 }
 0x3a2   :  { %1504 = vmatprep.mubr.f32.mxu1 %v3292_v25 }
 0x3a5   :  { %1505 = vmatmul.mubr.f32.gmra.mxu1 %v1244_v57 }
 0x3a6   :  { %1510 = vmatprep.mubr.f32.mxu1 %v3292_v25 }
 0x3a9   :  { %1511 = vmatmul.mubr.f32.gmra.mxu1 %v1245_v61 }
 0x3aa   :  { %1516 = vmatprep.mubr.f32.mxu1 %v3292_v25 }
 0x3ad   :  { %1517 = vmatmul.mubr.f32.gmra.mxu1 %v1246_v7 }
 0x3ae   :  { %1522 = vmatprep.mubr.f32.mxu1 %v3292_v25 }
 0x3b1   :  { %1523 = vmatmul.mubr.f32.gmra.mxu1 %v1247_v36 }
 0x419   :  { %v1314_v30 = vpop.f32.mrf.mxu0  ;;  %v1392_v45 = vpop.f32.mrf.mxu1 }
 0x41a   :  { %1834 = vrot.lane.b32.xlu0 %v1392_v45, %s2286_s24  ;;  %1645 = vrot.lane.b32.xlu1 %v1314_v30, %s2287_s1 }
 0x41b   :  { %v1316_v4 = vpop.f32.mrf.mxu0  ;;  %v1394_v47 = vpop.f32.mrf.mxu1 }
 0x41c   :  { %1566 = vst.msk [vmem:[#allocation2 + $0x8] sm:$0xff] %vm618_vm1, %v1316_v4  ;;  %1592 = vst.msk [vmem:[#allocation2 + $0xd8] sm:$0xff] %vm618_vm1, %v1394_v47 }
 0x41d   :  { %v1320_v34 = vpop.f32.mrf.mxu0  ;;  %v1398_v10 = vpop.f32.mrf.mxu1 }
 0x41f   :  { %v1322_v19 = vpop.f32.mrf.mxu0  ;;  %v1400_v1 = vpop.f32.mrf.mxu1 }
 0x420   :  { %1568 = vst.msk [vmem:[#allocation2 + $0x18] sm:$0xff] %vm618_vm1, %v1322_v19  ;;  %1594 = vst.msk [vmem:[#allocation2 + $0xe8] sm:$0xff] %vm618_vm1, %v1400_v1 }
 0x421   :  { %v1326_v50 = vpop.f32.mrf.mxu0  ;;  %v1404_v62 = vpop.f32.mrf.mxu1 }
 0x423   :  { %v1827_v48 = vld [vmem:[#allocation2 + $0xd8] sm:$0xff]  ;;  %v1638_v55 = vld [vmem:[#allocation2 + $0x8] sm:$0xff]  ;;  %v1328_v37 = vpop.f32.mrf.mxu0  ;;  %v1406_v16 = vpop.f32.mrf.mxu1 }
 0x424   :  { %1842 = vrot.lane.b32.xlu0 %v1827_v48, %s2286_s24  ;;  %1653 = vrot.lane.b32.xlu1 %v1638_v55, %s2287_s1  ;;  %1570 = vst.msk [vmem:[#allocation2 + $0x28] sm:$0xff] %vm618_vm1, %v1328_v37  ;;  %1596 = vst.msk [vmem:[#allocation2 + $0xf8] sm:$0xff] %vm618_vm1, %v1406_v16 }
 0x425   :  { %v1332_v13 = vpop.f32.mrf.mxu0  ;;  %v3440_v27 = vpop.f32.mrf.mxu1 }
 0x427   :  { %v1334_v3 = vpop.f32.mrf.mxu0  ;;  %v1412_v54 = vpop.f32.mrf.mxu1  ;;  %v1829_v60 = vld [vmem:[#allocation2 + $0xe8] sm:$0xff]  ;;  %v1640_v56 = vld [vmem:[#allocation2 + $0x18] sm:$0xff] }
 0x428   :  { %1836 = vrot.lane.b32.xlu1 %v1398_v10, %s2286_s24  ;;  %1647 = vrot.lane.b32.xlu0 %v1320_v34, %s2287_s1  ;;  %1572 = vst.msk [vmem:[#allocation2 + $0x38] sm:$0xff] %vm618_vm1, %v1334_v3  ;;  %1598 = vst.msk [vmem:[#allocation2 + $0x108] sm:$0xff] %vm618_vm1, %v1412_v54 }
 0x429   :  { %v1338_v29 = vpop.f32.mrf.mxu0  ;;  %v3446_v28 = vpop.f32.mrf.mxu1 }
 0x42b   :  { %v1340_v26 = vpop.f32.mrf.mxu0  ;;  %v1418_v51 = vpop.f32.mrf.mxu1  ;;  %v1831_v9 = vld [vmem:[#allocation2 + $0xf8] sm:$0xff]  ;;  %v1642_v52 = vld [vmem:[#allocation2 + $0x28] sm:$0xff] }
 0x42c   :  { %1844 = vrot.lane.b32.xlu1 %v1829_v60, %s2286_s24  ;;  %1655 = vrot.lane.b32.xlu0 %v1640_v56, %s2287_s1  ;;  %1574 = vst.msk [vmem:[#allocation2 + $0x48] sm:$0xff] %vm618_vm1, %v1340_v26  ;;  %1600 = vst.msk [vmem:[#allocation2 + $0x118] sm:$0xff] %vm618_vm1, %v1418_v51 }
 0x42d   :  { %v1344_v2 = vpop.f32.mrf.mxu0  ;;  %v3452_v63 = vpop.f32.mrf.mxu1 }
 0x42f   :  { %v1346_v8 = vpop.f32.mrf.mxu0  ;;  %v1424_v44 = vpop.f32.mrf.mxu1  ;;  %v1644_v41 = vld [vmem:[#allocation2 + $0x38] sm:$0xff] }
 0x430   :  { %1838 = vrot.lane.b32.xlu0 %v1404_v62, %s2286_s24  ;;  %1649 = vrot.lane.b32.xlu1 %v1326_v50, %s2287_s1  ;;  %1576 = vst.msk [vmem:[#allocation2 + $0x58] sm:$0xff] %vm618_vm1, %v1346_v8  ;;  %1602 = vst.msk [vmem:[#allocation2 + $0x128] sm:$0xff] %vm618_vm1, %v1424_v44 }
 0x431   :  { %v1350_v14 = vpop.f32.mrf.mxu0  ;;  %v3458_v25 = vpop.f32.mrf.mxu1 }
 0x433   :  { %v1352_v22 = vpop.f32.mrf.mxu0  ;;  %v1430_v59 = vpop.f32.mrf.mxu1  ;;  %v1701_v12 = vld [vmem:[#allocation2 + $0x48] sm:$0xff] }
 0x434   :  { %1846 = vrot.lane.b32.xlu0 %v1831_v9, %s2286_s24  ;;  %1657 = vrot.lane.b32.xlu1 %v1642_v52, %s2287_s1  ;;  %1578 = vst.msk [vmem:[#allocation2 + $0x68] sm:$0xff] %vm618_vm1, %v1352_v22  ;;  %1604 = vst.msk [vmem:[#allocation2 + $0x138] sm:$0xff] %vm618_vm1, %v1430_v59 }
 0x435   :  { %v1356_v11 = vpop.f32.mrf.mxu0  ;;  %v1434_v0 = vpop.f32.mrf.mxu1 }
 0x437   :  { %v1358_v43 = vpop.f32.mrf.mxu0  ;;  %v1436_v5 = vpop.f32.mrf.mxu1  ;;  %v1703_v58 = vld [vmem:[#allocation2 + $0x58] sm:$0xff] }
 0x438   :  { %1651 = vrot.lane.b32.xlu0 %v1332_v13, %s2287_s1  ;;  %1708 = vrot.lane.b32.xlu1 %v1338_v29, %s2288_s4  ;;  %1580 = vst.msk [vmem:[#allocation2 + $0x78] sm:$0xff] %vm618_vm1, %v1358_v43  ;;  %1606 = vst.msk [vmem:[#allocation2 + $0x148] sm:$0xff] %vm618_vm1, %v1436_v5 }
 0x439   :  { %v1362_v32 = vpop.f32.mrf.mxu0  ;;  %v1440_v21 = vpop.f32.mrf.mxu1 }
 0x43b   :  { %v1364_v35 = vpop.f32.mrf.mxu0  ;;  %v1442_v46 = vpop.f32.mrf.mxu1  ;;  %v1705_v39 = vld [vmem:[#allocation2 + $0x68] sm:$0xff] }
 0x43c   :  { %1659 = vrot.lane.b32.xlu0 %v1644_v41, %s2287_s1  ;;  %1716 = vrot.lane.b32.xlu1 %v1701_v12, %s2288_s4  ;;  %1582 = vst.msk [vmem:[#allocation2 + $0x88] sm:$0xff] %vm618_vm1, %v1364_v35  ;;  %1608 = vst.msk [vmem:[#allocation2 + $0x158] sm:$0xff] %vm618_vm1, %v1442_v46  ;;  %v1661_v41 = vlaneseq }
 0x43d   :  { %v1368_v23 = vpop.f32.mrf.mxu0  ;;  %v1446_v33 = vpop.f32.mrf.mxu1 }
 0x43e   :  { %v3514_v12 = vand.u32 127, %v1661_v41 }
 0x43f   :  { %v1370_v31 = vpop.f32.mrf.mxu0  ;;  %v1448_v6 = vpop.f32.mrf.mxu1  ;;  %v1924_v57 = vld [vmem:[#allocation2 + $0x148] sm:$0xff]  ;;  %v1707_v61 = vld [vmem:[#allocation2 + $0x78] sm:$0xff] }
 0x440   :  { %1710 = vrot.lane.b32.xlu0 %v1344_v2, %s2288_s4  ;;  %1712 = vrot.lane.b32.xlu1 %v1350_v14, %s2288_s4  ;;  %1584 = vst.msk [vmem:[#allocation2 + $0x98] sm:$0xff] %vm618_vm1, %v1370_v31  ;;  %1610 = vst.msk [vmem:[#allocation2 + $0x168] sm:$0xff] %vm618_vm1, %v1448_v6  ;;  %vm1848_vm2 = vcmp.lt.s32.totalorder %v3514_v12, 1  ;;  %vm1663_vm3 = vcmp.lt.s32.totalorder %v3514_v12, 15  ;;  %vm1724_vm4 = vcmp.lt.s32.totalorder %v3514_v12, 14  ;;  %vm1947_vm5 = vcmp.lt.s32.totalorder %v3514_v12, 127 }
 0x441   :  { %v1374_v18 = vpop.f32.mrf.mxu0  ;;  %v1452_v42 = vpop.f32.mrf.mxu1  ;;  %vm1786_vm6 = vcmp.lt.s32.totalorder %v3514_v12, 13  ;;  %vm2009_vm7 = vcmp.lt.s32.totalorder %v3514_v12, 115  ;;  %vm2071_vm8 = vcmp.lt.s32.totalorder %v3514_v12, 114  ;;  %vm2133_vm9 = vcmp.lt.s32.totalorder %v3514_v12, 113 }
 0x443   :  { %v1376_v49 = vpop.f32.mrf.mxu0  ;;  %v1454_v24 = vpop.f32.mrf.mxu1  ;;  %v1926_v47 = vld [vmem:[#allocation2 + $0x158] sm:$0xff]  ;;  %v1763_v34 = vld [vmem:[#allocation2 + $0x88] sm:$0xff] }
 0x444   :  { %1718 = vrot.lane.b32.xlu0 %v1703_v58, %s2288_s4  ;;  %1720 = vrot.lane.b32.xlu1 %v1705_v39, %s2288_s4  ;;  %1586 = vst.msk [vmem:[#allocation2 + $0xa8] sm:$0xff] %vm618_vm1, %v1376_v49  ;;  %1612 = vst.msk [vmem:[#allocation2 + $0x178] sm:$0xff] %vm618_vm1, %v1454_v24 }
 0x445   :  { %v1380_v40 = vpop.f32.mrf.mxu0  ;;  %v1458_v53 = vpop.f32.mrf.mxu1 }
 0x447   :  { %v1382_v17 = vpop.f32.mrf.mxu0  ;;  %v1460_v38 = vpop.f32.mrf.mxu1  ;;  %v1928_v62 = vld [vmem:[#allocation2 + $0x168] sm:$0xff]  ;;  %v1765_v48 = vld [vmem:[#allocation2 + $0x98] sm:$0xff] }
 0x448   :  { %1931 = vrot.lane.b32.xlu1 %v1434_v0, %s2289_s25  ;;  %1714 = vrot.lane.b32.xlu0 %v1356_v11, %s2288_s4  ;;  %1588 = vst.msk [vmem:[#allocation2 + $0xb8] sm:$0xff] %vm618_vm1, %v1382_v17  ;;  %1614 = vst.msk [vmem:[#allocation2 + $0x188] sm:$0xff] %vm618_vm1, %v1460_v38 }
 0x449   :  { %v1386_v20 = vpop.f32.mrf.mxu0  ;;  %v1464_v15 = vpop.f32.mrf.mxu1 }
 0x44b   :  { %v1466_v7 = vpop.f32.mrf.mxu1  ;;  %v1388_v36 = vpop.f32.mrf.mxu0  ;;  %v1930_v3 = vld [vmem:[#allocation2 + $0x178] sm:$0xff]  ;;  %v1767_v54 = vld [vmem:[#allocation2 + $0xa8] sm:$0xff] }
 0x44c   :  { %1939 = vrot.lane.b32.xlu1 %v1924_v57, %s2289_s25  ;;  %1722 = vrot.lane.b32.xlu0 %v1707_v61, %s2288_s4  ;;  %1616 = vst.msk [vmem:[#allocation2 + $0x198] sm:$0xff] %vm618_vm1, %v1466_v7  ;;  %1590 = vst.msk [vmem:[#allocation2 + $0xc8] sm:$0xff] %vm618_vm1, %v1388_v36 }
 0x44d   :  { %v1470_v30 = vpop.f32.mrf.mxu1 }
 0x44f   :  { %v1472_v45 = vpop.f32.mrf.mxu1  ;;  %v1986_v51 = vld [vmem:[#allocation2 + $0x188] sm:$0xff]  ;;  %v1769_v2 = vld [vmem:[#allocation2 + $0xb8] sm:$0xff] }
 0x450   :  { %1933 = vrot.lane.b32.xlu0 %v1440_v21, %s2289_s25  ;;  %1770 = vrot.lane.b32.xlu1 %v1362_v32, %s2290_s26  ;;  %1618 = vst.msk [vmem:[#allocation2 + $0x1a8] sm:$0xff] %vm618_vm1, %v1472_v45 }
 0x451   :  { %v1476_v4 = vpop.f32.mrf.mxu1 }
 0x453   :  { %v1478_v10 = vpop.f32.mrf.mxu1  ;;  %v1988_v52 = vld [vmem:[#allocation2 + $0x198] sm:$0xff]  ;;  %v1825_v22 = vld [vmem:[#allocation2 + $0xc8] sm:$0xff] }
 0x454   :  { %1941 = vrot.lane.b32.xlu0 %v1926_v47, %s2289_s25  ;;  %1778 = vrot.lane.b32.xlu1 %v1763_v34, %s2290_s26  ;;  %1620 = vst.msk [vmem:[#allocation2 + $0x1b8] sm:$0xff] %vm618_vm1, %v1478_v10 }
 0x455   :  { %v1482_v19 = vpop.f32.mrf.mxu1 }
 0x457   :  { %v1484_v1 = vpop.f32.mrf.mxu1  ;;  %v1990_v0 = vld [vmem:[#allocation2 + $0x1a8] sm:$0xff] }
 0x458   :  { %1935 = vrot.lane.b32.xlu1 %v1446_v33, %s2289_s25  ;;  %1772 = vrot.lane.b32.xlu0 %v1368_v23, %s2290_s26  ;;  %1622 = vst.msk [vmem:[#allocation2 + $0x1c8] sm:$0xff] %vm618_vm1, %v1484_v1  ;;  %v1672_v1 = vld [vmem:[%s3910_s5] sm:$0x3] }
 0x459   :  { %v1488_v50 = vpop.f32.mrf.mxu1 }
 0x45b   :  { %v1490_v55 = vpop.f32.mrf.mxu1  ;;  %v1992_v11 = vld [vmem:[#allocation2 + $0x1b8] sm:$0xff] }
 0x45c   :  { %1943 = vrot.lane.b32.xlu1 %v1928_v62, %s2289_s25  ;;  %1780 = vrot.lane.b32.xlu0 %v1765_v48, %s2290_s26  ;;  %1624 = vst.msk [vmem:[#allocation2 + $0x1d8] sm:$0xff] %vm618_vm1, %v1490_v55  ;;  %v2199_v62 = vld [vmem:[%s3910_s5 + $0x2] sm:$0x3] }
 0x45d   :  { %v1494_v37 = vpop.f32.mrf.mxu1 }
 0x45f   :  { %v1496_v16 = vpop.f32.mrf.mxu1  ;;  %v2048_v5 = vld [vmem:[#allocation2 + $0x1c8] sm:$0xff] }
 0x460   :  { %1937 = vrot.lane.b32.xlu0 %v1452_v42, %s2289_s25  ;;  %1774 = vrot.lane.b32.xlu1 %v1374_v18, %s2290_s26  ;;  %1626 = vst.msk [vmem:[#allocation2 + $0x1e8] sm:$0xff] %vm618_vm1, %v1496_v16 }
 0x461   :  { %v1500_v13 = vpop.f32.mrf.mxu1 }
 0x463   :  { %v1502_v29 = vpop.f32.mrf.mxu1  ;;  %v2050_v43 = vld [vmem:[#allocation2 + $0x1d8] sm:$0xff] }
 0x464   :  { %1945 = vrot.lane.b32.xlu0 %v1930_v3, %s2289_s25  ;;  %1782 = vrot.lane.b32.xlu1 %v1767_v54, %s2290_s26  ;;  %1628 = vst.msk [vmem:[#allocation2 + $0x1f8] sm:$0xff] %vm618_vm1, %v1502_v29 }
 0x465   :  { %v1506_v60 = vpop.f32.mrf.mxu1 }
 0x467   :  { %v1508_v56 = vpop.f32.mrf.mxu1  ;;  %v2052_v21 = vld [vmem:[#allocation2 + $0x1e8] sm:$0xff] }
 0x468   :  { %1993 = vrot.lane.b32.xlu1 %v1458_v53, %s2291_s27  ;;  %1776 = vrot.lane.b32.xlu0 %v1380_v40, %s2290_s26  ;;  %1630 = vst.msk [vmem:[#allocation2 + $0x208] sm:$0xff] %vm618_vm1, %v1508_v56 }
 0x469   :  { %v1512_v26 = vpop.f32.mrf.mxu1 }
 0x46b   :  { %v1514_v8 = vpop.f32.mrf.mxu1  ;;  %v2054_v32 = vld [vmem:[#allocation2 + $0x1f8] sm:$0xff] }
 0x46c   :  { %2001 = vrot.lane.b32.xlu1 %v1986_v51, %s2291_s27  ;;  %1784 = vrot.lane.b32.xlu0 %v1769_v2, %s2290_s26  ;;  %1632 = vst.msk [vmem:[#allocation2 + $0x218] sm:$0xff] %vm618_vm1, %v1514_v8 }
 0x46d   :  { %v1518_v44 = vpop.f32.mrf.mxu1 }
 0x46f   :  { %v1520_v14 = vpop.f32.mrf.mxu1  ;;  %v2110_v33 = vld [vmem:[#allocation2 + $0x208] sm:$0xff] }
 0x470   :  { %1995 = vrot.lane.b32.xlu0 %v1464_v15, %s2291_s27  ;;  %1832 = vrot.lane.b32.xlu1 %v1386_v20, %s2286_s24  ;;  %1634 = vst.msk [vmem:[#allocation2 + $0x228] sm:$0xff] %vm618_vm1, %v1520_v14 }
 0x471   :  { %v1524_v9 = vpop.f32.mrf.mxu1 }
 0x473   :  { %v1526_v59 = vpop.f32.mrf.mxu1  ;;  %v2112_v23 = vld [vmem:[#allocation2 + $0x218] sm:$0xff] }
 0x474   :  { %2003 = vrot.lane.b32.xlu0 %v1988_v52, %s2291_s27  ;;  %1840 = vrot.lane.b32.xlu1 %v1825_v22, %s2286_s24  ;;  %1636 = vst.msk [vmem:[#allocation2 + $0x238] sm:$0xff] %vm618_vm1, %v1526_v59 }
 0x477   :  { %v2114_v53 = vld [vmem:[#allocation2 + $0x228] sm:$0xff] }
 0x478   :  { %1999 = vrot.lane.b32.xlu0 %v1476_v4, %s2291_s27  ;;  %1997 = vrot.lane.b32.xlu1 %v1470_v30, %s2291_s27  ;;  %v1675_v30 = vshrl.u32 %v1661_v41, 7 }
 0x47a   :  { %v3562_v48 = vsub.s32 1, %v1675_v30 }
 0x47b   :  { %v2116_v40 = vld [vmem:[#allocation2 + $0x238] sm:$0xff] }
 0x47c   :  { %2007 = vrot.lane.b32.xlu0 %v1992_v11, %s2291_s27  ;;  %2005 = vrot.lane.b32.xlu1 %v1990_v0, %s2291_s27  ;;  %v1743_v54 = vrot.slane %v2199_v62, %v3562_v48 }
 0x480   :  { %2057 = vrot.lane.b32.xlu0 %v1488_v50, %s2292_s28  ;;  %2055 = vrot.lane.b32.xlu1 %v1482_v19, %s2292_s28  ;;  %v3557_v50 = vsub.s32 0, %v1675_v30 }
 0x482   :  { %v1677_v16 = vrot.slane %v1672_v1, %v3557_v50  ;;  %v1739_v3 = vrot.slane %v2199_v62, %v3557_v50 }
 0x484   :  { %2065 = vrot.lane.b32.xlu0 %v2050_v43, %s2292_s28  ;;  %2063 = vrot.lane.b32.xlu1 %v2048_v5, %s2292_s28 }
 0x488   :  { %2061 = vrot.lane.b32.xlu0 %v1500_v13, %s2292_s28  ;;  %2059 = vrot.lane.b32.xlu1 %v1494_v37, %s2292_s28  ;;  %v1681_v13 = vrot.slane %v1672_v1, %v3562_v48 }
 0x48c   :  { %2069 = vrot.lane.b32.xlu0 %v2054_v32, %s2292_s28  ;;  %2067 = vrot.lane.b32.xlu1 %v2052_v21, %s2292_s28  ;;  %v1835_v35 = vpop.permute.xlu0 %1834  ;;  %v1646_v46 = vpop.permute.xlu1 %1645 }
 0x490   :  { %2119 = vrot.lane.b32.xlu0 %v1512_v26, %s2293_s29  ;;  %2117 = vrot.lane.b32.xlu1 %v1506_v60, %s2293_s29 }
 0x494   :  { %2127 = vrot.lane.b32.xlu0 %v2112_v23, %s2293_s29  ;;  %2125 = vrot.lane.b32.xlu1 %v2110_v33, %s2293_s29 }
 0x496   :  { %v1843_v31 = vpop.permute.xlu0 %1842  ;;  %v1654_v6 = vpop.permute.xlu1 %1653 }
 0x497   :  { %v3520_v18 = vsel %vm1848_vm2, %v1835_v35, %v1843_v31  ;;  %v3524_v42 = vsel %vm1848_vm2, %v1843_v31, %v1835_v35  ;;  %v1664_v58 = vsel %vm1663_vm3, %v1646_v46, %v1654_v6  ;;  %v1668_v39 = vsel %vm1663_vm3, %v1654_v6, %v1646_v46 }
 0x498   :  { %2123 = vrot.lane.b32.xlu0 %v1524_v9, %s2293_s29  ;;  %2121 = vrot.lane.b32.xlu1 %v1518_v44, %s2293_s29  ;;  %v1684_v8 = vmul.f32 %v1677_v16, %v1668_v39  ;;  %v1685_v44 = vmul.f32 %v1681_v13, %v1664_v58 }
 0x49a   :  { %v1837_v49 = vpop.permute.xlu1 %1836  ;;  %v1648_v24 = vpop.permute.xlu0 %1647 }
 0x49c   :  { %2131 = vrot.lane.b32.xlu0 %v2116_v40, %s2293_s29  ;;  %2129 = vrot.lane.b32.xlu1 %v2114_v53, %s2293_s29 }
 0x49e   :  { %v1845_v17 = vpop.permute.xlu1 %1844  ;;  %v1656_v38 = vpop.permute.xlu0 %1655 }
 0x49f   :  { %v3532_v20 = vsel %vm1848_vm2, %v1837_v49, %v1845_v17  ;;  %v3536_v15 = vsel %vm1848_vm2, %v1845_v17, %v1837_v49  ;;  %v1665_v57 = vsel %vm1663_vm3, %v1648_v24, %v1656_v38  ;;  %v1669_v61 = vsel %vm1663_vm3, %v1656_v38, %v1648_v24 }
 0x4a0   :  { %v1686_v0 = vmul.f32 %v1677_v16, %v1669_v61  ;;  %v1687_v43 = vmul.f32 %v1681_v13, %v1665_v57 }
 0x4a2   :  { %v1839_v7 = vpop.permute.xlu0 %1838  ;;  %v1650_v36 = vpop.permute.xlu1 %1649 }
 0x4a6   :  { %v1847_v45 = vpop.permute.xlu0 %1846  ;;  %v1658_v4 = vpop.permute.xlu1 %1657 }
 0x4a7   :  { %v3544_v47 = vsel %vm1848_vm2, %v1839_v7, %v1847_v45  ;;  %v3548_v34 = vsel %vm1848_vm2, %v1847_v45, %v1839_v7  ;;  %v1666_v10 = vsel %vm1663_vm3, %v1650_v36, %v1658_v4  ;;  %v1670_v19 = vsel %vm1663_vm3, %v1658_v4, %v1650_v36 }
 0x4a8   :  { %v1688_v5 = vmul.f32 %v1677_v16, %v1670_v19  ;;  %v1689_v32 = vmul.f32 %v1681_v13, %v1666_v10 }
 0x4aa   :  { %v1652_v55 = vpop.permute.xlu0 %1651  ;;  %v1709_v37 = vpop.permute.xlu1 %1708 }
 0x4ae   :  { %v1660_v29 = vpop.permute.xlu0 %1659  ;;  %v1717_v60 = vpop.permute.xlu1 %1716 }
 0x4af   :  { %v1667_v56 = vsel %vm1663_vm3, %v1652_v55, %v1660_v29  ;;  %v1671_v26 = vsel %vm1663_vm3, %v1660_v29, %v1652_v55  ;;  %v1725_v51 = vsel %vm1724_vm4, %v1709_v37, %v1717_v60  ;;  %v1729_v2 = vsel %vm1724_vm4, %v1717_v60, %v1709_v37 }
 0x4b0   :  { %v1746_v14 = vmul.f32 %v1739_v3, %v1729_v2  ;;  %v1747_v9 = vmul.f32 %v1743_v54, %v1725_v51  ;;  %v1690_v4 = vmul.f32 %v1677_v16, %v1671_v26  ;;  %v1691_v10 = vmul.f32 %v1681_v13, %v1667_v56  ;;  %v2201_v2 = vld [vmem:[%s3910_s5 + $0x6] sm:$0x3]  ;;  %v2200_v16 = vld [vmem:[%s3910_s5 + $0x4] sm:$0x3] }
 0x4b1   :  { %v3615_v13 = vrot.slane %v2201_v2, %v3557_v50  ;;  %v1805_v56 = vrot.slane %v2200_v16, %v3562_v48 }
 0x4b2   :  { %v3577_v52 = vadd.f32 %v1746_v14, %v1684_v8  ;;  %v3579_v22 = vadd.f32 %v1747_v9, %v1685_v44  ;;  %v1711_v59 = vpop.permute.xlu0 %1710  ;;  %v1713_v11 = vpop.permute.xlu1 %1712  ;;  %v2202_v9 = vld [vmem:[%s3910_s5 + $0x8] sm:$0x3] }
 0x4b6   :  { %v1719_v21 = vpop.permute.xlu0 %1718  ;;  %v1721_v41 = vpop.permute.xlu1 %1720 }
 0x4b7   :  { %v1726_v35 = vsel %vm1724_vm4, %v1711_v59, %v1719_v21  ;;  %v1730_v46 = vsel %vm1724_vm4, %v1719_v21, %v1711_v59  ;;  %v1727_v23 = vsel %vm1724_vm4, %v1713_v11, %v1721_v41  ;;  %v1731_v33 = vsel %vm1724_vm4, %v1721_v41, %v1713_v11 }
 0x4b8   :  { %v1748_v31 = vmul.f32 %v1739_v3, %v1730_v46  ;;  %v1749_v6 = vmul.f32 %v1743_v54, %v1726_v35  ;;  %v1750_v58 = vmul.f32 %v1739_v3, %v1731_v33  ;;  %v1751_v39 = vmul.f32 %v1743_v54, %v1727_v23 }
 0x4ba   :  { %v1756_v49 = vadd.f32 %v1748_v31, %v1686_v0  ;;  %v1757_v24 = vadd.f32 %v1749_v6, %v1687_v43  ;;  %v1758_v40 = vadd.f32 %v1750_v58, %v1688_v5  ;;  %v1759_v53 = vadd.f32 %v1751_v39, %v1689_v32  ;;  %v1932_v17 = vpop.permute.xlu1 %1931  ;;  %v1715_v38 = vpop.permute.xlu0 %1714 }
 0x4bb   :  { %v1900_v5 = vrot.slane %v2202_v9, %v3557_v50  ;;  %v1872_v32 = vmul.f32 %v3615_v13, %v3524_v42 }
 0x4bd   :  { %v1909_v6 = vmul.f32 %v1900_v5, %v3446_v28 }
 0x4be   :  { %v1940_v57 = vpop.permute.xlu1 %1939  ;;  %v1723_v61 = vpop.permute.xlu0 %1722 }
 0x4bf   :  { %v3592_v7 = vsel %vm1947_vm5, %v1932_v17, %v1940_v57  ;;  %v3596_v36 = vsel %vm1947_vm5, %v1940_v57, %v1932_v17  ;;  %v1728_v30 = vsel %vm1724_vm4, %v1715_v38, %v1723_v61  ;;  %v1732_v45 = vsel %vm1724_vm4, %v1723_v61, %v1715_v38 }
 0x4c0   :  { %v1752_v19 = vmul.f32 %v1739_v3, %v1732_v45  ;;  %v1753_v1 = vmul.f32 %v1743_v54, %v1728_v30  ;;  %v3618_v3 = vrot.slane %v2201_v2, %v3562_v48  ;;  %v1801_v54 = vrot.slane %v2200_v16, %v3557_v50 }
 0x4c1   :  { %v1874_v38 = vmul.f32 %v3615_v13, %v3536_v15 }
 0x4c2   :  { %v1760_v62 = vadd.f32 %v1752_v19, %v1690_v4  ;;  %v1761_v55 = vadd.f32 %v1753_v1, %v1691_v10  ;;  %v3602_v37 = vpop.permute.xlu0 %1933  ;;  %v1771_v29 = vpop.permute.xlu1 %1770  ;;  %v1873_v21 = vmul.f32 %v3618_v3, %v3520_v18  ;;  %v1875_v57 = vmul.f32 %v3618_v3, %v3532_v20 }
 0x4c3   :  { %v1911_v19 = vmul.f32 %v1900_v5, %v3452_v63  ;;  %v1876_v63 = vmul.f32 %v3615_v13, %v3548_v34  ;;  %v1904_v34 = vrot.slane %v2202_v9, %v3562_v48 }
 0x4c6   :  { %v3604_v60 = vpop.permute.xlu0 %1941  ;;  %v1779_v51 = vpop.permute.xlu1 %1778 }
 0x4c7   :  { %v1787_v16 = vsel %vm1786_vm6, %v1771_v29, %v1779_v51 }
 0x4ca   :  { %v3609_v8 = vpop.permute.xlu1 %1935  ;;  %v1773_v44 = vpop.permute.xlu0 %1772 }
 0x4ce   :  { %v3623_v26 = vpop.permute.xlu1 %1943  ;;  %v1781_v14 = vpop.permute.xlu0 %1780 }
 0x4cf   :  { %v1788_v59 = vsel %vm1786_vm6, %v1773_v44, %v1781_v14  ;;  %v1792_v11 = vsel %vm1786_vm6, %v1781_v14, %v1773_v44  ;;  %v1791_v14 = vsel %vm1786_vm6, %v1779_v51, %v1771_v29 }
 0x4d0   :  { %v1810_v0 = vmul.f32 %v1801_v54, %v1792_v11  ;;  %v1811_v43 = vmul.f32 %v1805_v56, %v1788_v59  ;;  %v1877_v59 = vmul.f32 %v3618_v3, %v3544_v47 }
 0x4d2   :  { %v1818_v41 = vadd.f32 %v1810_v0, %v1756_v49  ;;  %v1819_v35 = vadd.f32 %v1811_v43, %v1757_v24  ;;  %v3637_v46 = vpop.permute.xlu0 %1937  ;;  %v1775_v23 = vpop.permute.xlu1 %1774 }
 0x4d4   :  { %v1880_v33 = vadd.f32 %v1872_v32, %v1818_v41  ;;  %v3639_v31 = vadd.f32 %v1873_v21, %v1819_v35  ;;  %v1913_v21 = vmul.f32 %v1900_v5, %v3458_v25  ;;  %v2203_v41 = vld [vmem:[%s3910_s5 + $0xa] sm:$0x3]  ;;  %v1808_v35 = vmul.f32 %v1801_v54, %v1791_v14 }
 0x4d5   :  { %v3690_v25 = vrot.slane %v2203_v41, %v3562_v48  ;;  %v1949_v14 = vsel %vm1947_vm5, %v3602_v37, %v3604_v60 }
 0x4d6   :  { %v3642_v58 = vpop.permute.xlu0 %1945  ;;  %v1783_v39 = vpop.permute.xlu1 %1782  ;;  %v3644_v17 = vadd.f32 %v1909_v6, %v1880_v33  ;;  %v1887_v6 = vld [vmem:[#allocation2 + $0x108] sm:$0xff] }
 0x4d7   :  { %v1789_v42 = vsel %vm1786_vm6, %v1775_v23, %v1783_v39  ;;  %v1793_v18 = vsel %vm1786_vm6, %v1783_v39, %v1775_v23  ;;  %v1809_v23 = vmul.f32 %v1805_v56, %v1787_v16  ;;  %v1816_v39 = vadd.f32 %v1808_v35, %v3577_v52  ;;  %v2205_v16 = vld [vmem:[%s3910_s5 + $0xe] sm:$0x3] }
 0x4d8   :  { %v1812_v49 = vmul.f32 %v1801_v54, %v1793_v18  ;;  %v1813_v24 = vmul.f32 %v1805_v56, %v1789_v42  ;;  %v1970_v52 = vmul.f32 %v3690_v25, %v3596_v36  ;;  %v1950_v35 = vsel %vm1947_vm5, %v3609_v8, %v3623_v26 }
 0x4d9   :  { %v1817_v9 = vadd.f32 %v1809_v23, %v3579_v22  ;;  %v1954_v23 = vsel %vm1947_vm5, %v3623_v26, %v3609_v8 }
 0x4da   :  { %v1820_v28 = vadd.f32 %v1812_v49, %v1758_v40  ;;  %v1821_v61 = vadd.f32 %v1813_v24, %v1759_v53  ;;  %v3654_v30 = vpop.permute.xlu1 %1993  ;;  %v1777_v45 = vpop.permute.xlu0 %1776  ;;  %v1907_v49 = vmul.f32 %v1900_v5, %v3440_v27  ;;  %v1908_v24 = vmul.f32 %v1904_v34, %v1887_v6 }
 0x4dc   :  { %v1882_v4 = vadd.f32 %v1874_v38, %v1820_v28  ;;  %v3656_v10 = vadd.f32 %v1875_v57, %v1821_v61 }
 0x4de   :  { %v3659_v1 = vpop.permute.xlu1 %2001  ;;  %v1785_v2 = vpop.permute.xlu0 %1784  ;;  %v3661_v44 = vadd.f32 %v1911_v19, %v1882_v4 }
 0x4df   :  { %v1790_v15 = vsel %vm1786_vm6, %v1777_v45, %v1785_v2  ;;  %v1794_v20 = vsel %vm1786_vm6, %v1785_v2, %v1777_v45 }
 0x4e0   :  { %v1814_v40 = vmul.f32 %v1801_v54, %v1794_v20  ;;  %v1815_v53 = vmul.f32 %v1805_v56, %v1790_v15  ;;  %v1889_v15 = vld [vmem:[#allocation2 + $0x118] sm:$0xff] }
 0x4e1   :  { %v1893_v20 = vld [vmem:[#allocation2 + $0x138] sm:$0xff] }
 0x4e2   :  { %v1822_v11 = vadd.f32 %v1814_v40, %v1760_v62  ;;  %v1823_v0 = vadd.f32 %v1815_v53, %v1761_v55  ;;  %v3675_v43 = vpop.permute.xlu0 %1995  ;;  %v1833_v32 = vpop.permute.xlu1 %1832  ;;  %v3687_v55 = vrot.slane %v2203_v41, %v3557_v50  ;;  %v1891_v40 = vld [vmem:[#allocation2 + $0x128] sm:$0xff] }
 0x4e4   :  { %v1884_v29 = vadd.f32 %v1876_v63, %v1822_v11  ;;  %v3681_v51 = vadd.f32 %v1877_v59, %v1823_v0  ;;  %v1969_v45 = vmul.f32 %v3687_v55, %v3592_v7  ;;  %v2204_v7 = vld [vmem:[%s3910_s5 + $0xc] sm:$0x3]  ;;  %v1910_v63 = vmul.f32 %v1904_v34, %v1889_v15  ;;  %v2206_v0 = vld [vmem:[%s3910_s5 + $0x10] sm:$0x3] }
 0x4e5   :  { %v1914_v59 = vmul.f32 %v1904_v34, %v1893_v20  ;;  %v1912_v11 = vmul.f32 %v1904_v34, %v1891_v40  ;;  %v3737_v41 = vrot.slane %v2204_v7, %v3562_v48  ;;  %v1971_v34 = vmul.f32 %v3687_v55, %v1949_v14 }
 0x4e6   :  { %v2004_v33 = vpop.permute.xlu0 %2003  ;;  %v1841_v47 = vpop.permute.xlu1 %1840  ;;  %v3684_v62 = vadd.f32 %v1913_v21, %v1884_v29  ;;  %v3734_v21 = vrot.slane %v2204_v7, %v3557_v50  ;;  %v3758_v6 = vrot.slane %v2206_v0, %v3557_v50  ;;  %v1918_v26 = vadd.f32 %v1910_v63, %v3639_v31 }
 0x4e7   :  { %v1849_v54 = vsel %vm1848_vm2, %v1833_v32, %v1841_v47  ;;  %v1853_v56 = vsel %vm1848_vm2, %v1841_v47, %v1833_v32  ;;  %v1953_v32 = vsel %vm1947_vm5, %v3604_v60, %v3602_v37  ;;  %v3749_v37 = vrot.slane %v2205_v16, %v3557_v50 }
 0x4e8   :  { %v1870_v42 = vmul.f32 %v3615_v13, %v1853_v56  ;;  %v1871_v18 = vmul.f32 %v3618_v3, %v1849_v54  ;;  %v3755_v47 = vrot.slane %v2205_v16, %v3562_v48  ;;  %v3761_v54 = vrot.slane %v2206_v0, %v3562_v48 }
 0x4e9   :  { %v1972_v8 = vmul.f32 %v3690_v25, %v1953_v32  ;;  %v2011_v56 = vsel %vm2009_vm7, %v3675_v43, %v2004_v33  ;;  %v3773_v50 = vmul.f32 %v3687_v55, %v1950_v35  ;;  %v3776_v48 = vmul.f32 %v3690_v25, %v1954_v23 }
 0x4ea   :  { %v1878_v38 = vadd.f32 %v1870_v42, %v1816_v39  ;;  %v1879_v57 = vadd.f32 %v1871_v18, %v1817_v9  ;;  %v3701_v28 = vpop.permute.xlu0 %1999  ;;  %v3703_v61 = vpop.permute.xlu1 %1997  ;;  %v2015_v39 = vsel %vm2009_vm7, %v2004_v33, %v3675_v43  ;;  %v1951_v31 = vsel %vm1947_vm5, %v3637_v46, %v3642_v58 }
 0x4eb   :  { %v1955_v9 = vsel %vm1947_vm5, %v3642_v58, %v3637_v46  ;;  %v2010_v43 = vsel %vm2009_vm7, %v3654_v30, %v3659_v1  ;;  %v2014_v33 = vsel %vm2009_vm7, %v3659_v1, %v3654_v30  ;;  %v2033_v46 = vmul.f32 %v3734_v21, %v2011_v56 }
 0x4ec   :  { %v1915_v22 = vadd.f32 %v1907_v49, %v1878_v38  ;;  %v1916_v4 = vadd.f32 %v1908_v24, %v1879_v57  ;;  %v2034_v58 = vmul.f32 %v3737_v41, %v2015_v39  ;;  %v1975_v30 = vmul.f32 %v3687_v55, %v1951_v31 }
 0x4ed   :  { %v1976_v1 = vmul.f32 %v3690_v25, %v1955_v9  ;;  %v1920_v16 = vadd.f32 %v1912_v11, %v3656_v10 }
 0x4ee   :  { %v2008_v13 = vpop.permute.xlu0 %2007  ;;  %v3709_v19 = vpop.permute.xlu1 %2005  ;;  %v3711_v3 = vadd.f32 %v1969_v45, %v1915_v22  ;;  %v3713_v27 = vadd.f32 %v1970_v52, %v1916_v4  ;;  %v1979_v45 = vadd.f32 %v1971_v34, %v3644_v17  ;;  %v1980_v52 = vadd.f32 %v1972_v8, %v1918_v26 }
 0x4ef   :  { %v2031_v22 = vmul.f32 %v3734_v21, %v2010_v43  ;;  %v2032_v4 = vmul.f32 %v3737_v41, %v2014_v33  ;;  %v2013_v20 = vsel %vm2009_vm7, %v3701_v28, %v2008_v13  ;;  %v2017_v55 = vsel %vm2009_vm7, %v2008_v13, %v3701_v28 }
 0x4f0   :  { %v2041_v7 = vadd.f32 %v2033_v46, %v1979_v45  ;;  %v2012_v14 = vsel %vm2009_vm7, %v3703_v61, %v3709_v19  ;;  %v2016_v28 = vsel %vm2009_vm7, %v3709_v19, %v3703_v61  ;;  %v2037_v0 = vmul.f32 %v3734_v21, %v2013_v20 }
 0x4f1   :  { %v2039_v13 = vadd.f32 %v2031_v22, %v3711_v3  ;;  %v2040_v63 = vadd.f32 %v2032_v4, %v3713_v27  ;;  %v2035_v31 = vmul.f32 %v3734_v21, %v2012_v14  ;;  %v2036_v9 = vmul.f32 %v3737_v41, %v2016_v28 }
 0x4f2   :  { %v2058_v5 = vpop.permute.xlu0 %2057  ;;  %v2056_v2 = vpop.permute.xlu1 %2055  ;;  %v1982_v22 = vadd.f32 %v3776_v48, %v1920_v16 }
 0x4f6   :  { %v2066_v53 = vpop.permute.xlu0 %2065  ;;  %v2064_v36 = vpop.permute.xlu1 %2063 }
 0x4f7   :  { %v2073_v42 = vsel %vm2071_vm8, %v2058_v5, %v2066_v53  ;;  %v2077_v18 = vsel %vm2071_vm8, %v2066_v53, %v2058_v5  ;;  %v2072_v38 = vsel %vm2071_vm8, %v2056_v2, %v2064_v36  ;;  %v2076_v57 = vsel %vm2071_vm8, %v2064_v36, %v2056_v2 }
 0x4f8   :  { %v2095_v5 = vmul.f32 %v3749_v37, %v2073_v42  ;;  %v2096_v15 = vmul.f32 %v3755_v47, %v2077_v18  ;;  %v2093_v25 = vmul.f32 %v3749_v37, %v2072_v38  ;;  %v2094_v17 = vmul.f32 %v3755_v47, %v2076_v57 }
 0x4f9   :  { %v2042_v53 = vadd.f32 %v2034_v58, %v1980_v52  ;;  %v1922_v36 = vadd.f32 %v1914_v59, %v3681_v51  ;;  %v2038_v51 = vmul.f32 %v3737_v41, %v2017_v55  ;;  %v1983_v38 = vadd.f32 %v1975_v30, %v3684_v62 }
 0x4fa   :  { %v2062_v60 = vpop.permute.xlu0 %2061  ;;  %v3751_v29 = vpop.permute.xlu1 %2059  ;;  %v2103_v59 = vadd.f32 %v2095_v5, %v2041_v7  ;;  %v2101_v11 = vadd.f32 %v2093_v25, %v2039_v13  ;;  %v2102_v32 = vadd.f32 %v2094_v17, %v2040_v63  ;;  %v1981_v52 = vadd.f32 %v3773_v50, %v3661_v44 }
 0x4fb   :  { %v2104_v10 = vadd.f32 %v2096_v15, %v2042_v53  ;;  %v1984_v57 = vadd.f32 %v1976_v1, %v1922_v36  ;;  %v2045_v44 = vadd.f32 %v2037_v0, %v1983_v38 }
 0x4fc   :  { %v2043_v48 = vadd.f32 %v2035_v31, %v1981_v52 }
 0x4fd   :  { %v2046_v62 = vadd.f32 %v2038_v51, %v1984_v57 }
 0x4fe   :  { %v2070_v49 = vpop.permute.xlu0 %2069  ;;  %v2068_v24 = vpop.permute.xlu1 %2067 }
 0x4ff   :  { %v2075_v35 = vsel %vm2071_vm8, %v2062_v60, %v2070_v49  ;;  %v2079_v23 = vsel %vm2071_vm8, %v2070_v49, %v2062_v60  ;;  %v2074_v43 = vsel %vm2071_vm8, %v3751_v29, %v2068_v24  ;;  %v2078_v33 = vsel %vm2071_vm8, %v2068_v24, %v3751_v29 }
 0x500   :  { %v2099_v21 = vmul.f32 %v3749_v37, %v2075_v35  ;;  %v2100_v41 = vmul.f32 %v3755_v47, %v2079_v23  ;;  %v2097_v29 = vmul.f32 %v3749_v37, %v2074_v43  ;;  %v2098_v50 = vmul.f32 %v3755_v47, %v2078_v33 }
 0x501   :  { %v2044_v24 = vadd.f32 %v2036_v9, %v1982_v22 }
 0x502   :  { %v2120_v2 = vpop.permute.xlu0 %2119  ;;  %v2118_v40 = vpop.permute.xlu1 %2117  ;;  %v2107_v1 = vadd.f32 %v2099_v21, %v2045_v44  ;;  %v2108_v4 = vadd.f32 %v2100_v41, %v2046_v62  ;;  %v2105_v17 = vadd.f32 %v2097_v29, %v2043_v48 }
 0x506   :  { %v2128_v34 = vpop.permute.xlu0 %2127  ;;  %v2126_v61 = vpop.permute.xlu1 %2125 }
 0x507   :  { %v2135_v19 = vsel %vm2133_vm9, %v2120_v2, %v2128_v34  ;;  %v2139_v3 = vsel %vm2133_vm9, %v2128_v34, %v2120_v2  ;;  %v2134_v27 = vsel %vm2133_vm9, %v2118_v40, %v2126_v61  ;;  %v2138_v8 = vsel %vm2133_vm9, %v2126_v61, %v2118_v40 }
 0x508   :  { %v2157_v26 = vmul.f32 %v3758_v6, %v2135_v19  ;;  %v2158_v56 = vmul.f32 %v3761_v54, %v2139_v3  ;;  %v2155_v60 = vmul.f32 %v3758_v6, %v2134_v27  ;;  %v2156_v39 = vmul.f32 %v3761_v54, %v2138_v8 }
 0x509   :  { %v2106_v2 = vadd.f32 %v2098_v50, %v2044_v24 }
 0x50a   :  { %v2165_v42 = vadd.f32 %v2157_v26, %v2103_v59  ;;  %v2166_v18 = vadd.f32 %v2158_v56, %v2104_v10  ;;  %v2163_v49 = vadd.f32 %v2155_v60, %v2101_v11  ;;  %v2164_v46 = vadd.f32 %v2156_v39, %v2102_v32  ;;  %v2124_v58 = vpop.permute.xlu0 %2123  ;;  %v2122_v45 = vpop.permute.xlu1 %2121 }
 0x50c   :  { %2173 = vst [vmem:[%s3911_s6 + $0x10] sm:$0xff] %v2165_v42  ;;  %2174 = vst.msk [vmem:[%s3911_s6 + $0x18] sm:$0xff] %vm618_vm1, %v2166_v18 }
 0x50d   :  { %2171 = vst [vmem:[%s3911_s6] sm:$0xff] %v2163_v49  ;;  %2172 = vst.msk [vmem:[%s3911_s6 + $0x8] sm:$0xff] %vm618_vm1, %v2164_v46 }
 0x50e   :  { %v2132_v30 = vpop.permute.xlu0 %2131  ;;  %v2130_v20 = vpop.permute.xlu1 %2129 }
 0x50f   :  { %v2137_v5 = vsel %vm2133_vm9, %v2124_v58, %v2132_v30  ;;  %v2141_v15 = vsel %vm2133_vm9, %v2132_v30, %v2124_v58  ;;  %v2136_v37 = vsel %vm2133_vm9, %v2122_v45, %v2130_v20  ;;  %v2140_v47 = vsel %vm2133_vm9, %v2130_v20, %v2122_v45 }
 0x510   :  { %v2161_v55 = vmul.f32 %v3758_v6, %v2137_v5  ;;  %v2162_v25 = vmul.f32 %v3761_v54, %v2141_v15  ;;  %v2159_v40 = vmul.f32 %v3758_v6, %v2136_v37  ;;  %v2160_v7 = vmul.f32 %v3761_v54, %v2140_v47 }
 0x512   :  { %v2169_v53 = vadd.f32 %v2161_v55, %v2107_v1  ;;  %v2170_v36 = vadd.f32 %v2162_v25, %v2108_v4  ;;  %v2167_v16 = vadd.f32 %v2159_v40, %v2105_v17  ;;  %v2168_v14 = vadd.f32 %v2160_v7, %v2106_v2 }
 0x514   :  { %2177 = vst [vmem:[%s3911_s6 + $0x30] sm:$0xff] %v2169_v53  ;;  %2178 = vst.msk [vmem:[%s3911_s6 + $0x38] sm:$0xff] %vm618_vm1, %v2170_v36 }
 0x515   :  { %2175 = vst [vmem:[%s3911_s6 + $0x20] sm:$0xff] %v2167_v16  ;;  %2176 = vst.msk [vmem:[%s3911_s6 + $0x28] sm:$0xff] %vm618_vm1, %v2168_v14 }

</bundles_post_ra>
